<compile_context>
chip_gen: v7x
topology: tpu7x:2x2x1
jax: 0.10.0
libtpu: 0.0.40
codegen_flags: <defaults>
</compile_context>

<pallas_src>
import functools

import jax
import jax.numpy as jnp
from jax.experimental import pallas as pl
from jax.experimental.pallas import tpu as pltpu

# ----------------------------- config (small, deterministic) -----------------
N = 16          # number of cells (batch)
S = 16          # sequence length fed to the (synthetic) encoders
VOCAB = 64      # synthetic token-embedding vocab
D_BERT = 768    # BERT / CodeBERT hidden size (fixed by the module)
D_TYPE = 8      # nn.Embedding(2, 8)
HIDDEN = 768    # hidden_dim default of the module
TK = 256        # K-slab size for the pooler contractions (768 = 3 * 256)


# ----------------------------- Pallas kernel ---------------------------------
def head_kernel(ct_ref,            # (N, 1) int32        cell_types
                pc_ref,            # (N, TK) bf16        codebert pre-pooler slab
                pt_ref,            # (N, TK) bf16        bert pre-pooler slab
                wc_ref,            # (TK, D_BERT) bf16   codebert pooler dense slab
                bc_ref,            # (1, D_BERT) f32
                wt_ref,            # (TK, D_BERT) bf16   bert pooler dense slab
                bt_ref,            # (1, D_BERT) f32
                wp_emb_ref,        # (D_BERT, HIDDEN) bf16  proj weight (emb rows), resident
                tcontrib_ref,      # (2, HIDDEN) f32     precomputed type_tab@wp_type + bp
                wcls_ref,          # (1, HIDDEN) f32     classifier weight (row layout)
                bcls_ref,          # (1, 1) f32
                out_ref,           # (N, 1) f32
                acc_code,          # (N, D_BERT) f32 scratch accumulator
                acc_text):         # (N, D_BERT) f32 scratch accumulator
    k = pl.program_id(0)

    @pl.when(k == 0)
    def _():
        acc_code[...] = jnp.zeros_like(acc_code)
        acc_text[...] = jnp.zeros_like(acc_text)

    # --- streamed pooler contractions: bf16 MXU operands, f32 accumulation ---
    acc_code[...] += jnp.dot(pc_ref[...], wc_ref[...],
                             preferred_element_type=jnp.float32)
    acc_text[...] += jnp.dot(pt_ref[...], wt_ref[...],
                             preferred_element_type=jnp.float32)

    @pl.when(k == pl.num_programs(0) - 1)
    def _():
        is_code = ct_ref[...] == 1                                  # (N, 1) bool

        # pooler_output = tanh(dense(hidden_state)) for each encoder
        code_pool = jnp.tanh(acc_code[...] + bc_ref[...])
        text_pool = jnp.tanh(acc_text[...] + bt_ref[...])

        # scatter-by-mask (equivalent to the PyTorch indexed assignment)
        emb = jnp.where(is_code, code_pool, text_pool)              # (N, D_BERT) f32

        # proj(concat([emb, type_emb])) + bp:
        #   emb part -> one bf16 MXU matmul (single cast just before the dot);
        #   type part + bias -> precomputed (2, HIDDEN) row select (VPU, free).
        h = jnp.dot(emb.astype(wp_emb_ref.dtype), wp_emb_ref[...],
                    preferred_element_type=jnp.float32)
        h = h + jnp.where(is_code, tcontrib_ref[1:2, :], tcontrib_ref[0:1, :])
        h = jnp.maximum(h, 0.0)                                     # ReLU
        # dropout(p=0.1): eval-mode identity.

        # classifier: 1-wide output -> VPU multiply + XLU lane reduce, not MXU.
        out_ref[...] = (jnp.sum(h * wcls_ref[...], axis=-1, keepdims=True)
                        + bcls_ref[...])


def head_pallas(cell_types, pooled_code, pooled_text, params, *, tk=TK):
    n = cell_types.shape[0]
    ct2d = cell_types.reshape(n, 1).astype(jnp.int32)

    # Fold the tiny K=8 type-embedding projection and the proj bias into one
    # precomputed (2, HIDDEN) f32 constant (removes a padded f32 MXU matmul).
    tcontrib = (params["type_tab"] @ params["wp_type"]
                + params["bp"]).astype(jnp.float32)                 # (2, HIDDEN)

    ksteps = D_BERT // tk
    const = lambda shape: pl.BlockSpec(shape, lambda k: (0, 0))

    # To scale the batch: add a leading "parallel" grid axis and give ct / pc /
    # pt / out (TILE_N, .) blocks indexed by it, keeping every weight BlockSpec
    # at a constant block index so weights stay resident across batch tiles.
    out = pl.pallas_call(
        head_kernel,
        out_shape=jax.ShapeDtypeStruct((n, 1), jnp.float32),
        grid=(ksteps,),
        in_specs=[
            const((n, 1)),                                   # cell_types
            pl.BlockSpec((n, tk), lambda k: (0, k)),         # pooled_code slab
            pl.BlockSpec((n, tk), lambda k: (0, k)),         # pooled_text slab
            pl.BlockSpec((tk, D_BERT), lambda k: (k, 0)),    # wc slab
            const((1, D_BERT)),                              # bc
            pl.BlockSpec((tk, D_BERT), lambda k: (k, 0)),    # wt slab
            const((1, D_BERT)),                              # bt
            const((D_BERT, HIDDEN)),                         # wp_emb (resident)
            const((2, HIDDEN)),                              # tcontrib
            const((1, HIDDEN)),                              # classifier W (row)
            const((1, 1)),                                   # classifier b
        ],
        out_specs=const((n, 1)),
        scratch_shapes=[pltpu.VMEM((n, D_BERT), jnp.float32),
                        pltpu.VMEM((n, D_BERT), jnp.float32)],
        compiler_params=pltpu.CompilerParams(
            dimension_semantics=("arbitrary",),              # K-reduction axis
            vmem_limit_bytes=32 * 1024 * 1024,               # fits v7x's 64 MiB
        ),
    )(ct2d, pooled_code, pooled_text,
      params["wc"], params["bc"], params["wt"], params["bt"],
      params["wp_emb"], tcontrib,
      params["wcls"], params["bcls"])
    return out[:, 0]          # scores.squeeze(-1)


# ----------------------------- synthetic encoders (glue, plain JAX) ----------
def synthetic_pre_pooler(tok_table, input_ids, attention_mask):
    """Stand-in for a transformer's final hidden state -> pre-pooler vector."""
    tok = tok_table[input_ids]                                   # (N, S, D)
    m = attention_mask.astype(jnp.float32)[..., None]            # (N, S, 1)
    return (tok * m).sum(axis=1) / jnp.clip(m.sum(axis=1), 1.0)  # (N, D)


# ----------------------------- pure-JAX reference -----------------------------
def reference(cell_types, pooled_code, pooled_text, p):
    f32 = lambda a: a.astype(jnp.float32)
    code_pool = jnp.tanh(f32(pooled_code) @ f32(p["wc"]) + p["bc"])
    text_pool = jnp.tanh(f32(pooled_text) @ f32(p["wt"]) + p["bt"])
    is_code = (cell_types == 1)[:, None]
    emb = jnp.where(is_code, code_pool, text_pool)
    type_emb = p["type_tab"][cell_types]
    h = (f32(emb.astype(jnp.bfloat16)) @ f32(p["wp_emb"])
         + type_emb @ p["wp_type"] + p["bp"])
    h = jnp.maximum(h, 0.0)
    return (h * p["wcls"][0]).sum(axis=-1) + p["bcls"][0, 0]


# ----------------------------- main -------------------------------------------
if __name__ == "__main__":
    key = jax.random.PRNGKey(0)
    ks = jax.random.split(key, 16)

    # deterministic parameters (big matrices in bf16, small tensors in f32)
    scale = 0.02
    params = {
        "type_tab": scale * jax.random.normal(ks[0], (2, D_TYPE), jnp.float32),
        "wc": (scale * jax.random.normal(ks[1], (D_BERT, D_BERT),
                                         jnp.float32)).astype(jnp.bfloat16),
        "bc": scale * jax.random.normal(ks[2], (1, D_BERT), jnp.float32),
        "wt": (scale * jax.random.normal(ks[3], (D_BERT, D_BERT),
                                         jnp.float32)).astype(jnp.bfloat16),
        "bt": scale * jax.random.normal(ks[4], (1, D_BERT), jnp.float32),
        "wp_emb": (scale * jax.random.normal(ks[5], (D_BERT, HIDDEN),
                                             jnp.float32)).astype(jnp.bfloat16),
        "wp_type": scale * jax.random.normal(ks[6], (D_TYPE, HIDDEN), jnp.float32),
        "bp": scale * jax.random.normal(ks[7], (1, HIDDEN), jnp.float32),
        "wcls": scale * jax.random.normal(ks[8], (1, HIDDEN), jnp.float32),
        "bcls": scale * jax.random.normal(ks[9], (1, 1), jnp.float32),
    }
    code_tok_table = scale * jax.random.normal(ks[10], (VOCAB, D_BERT), jnp.float32)
    text_tok_table = scale * jax.random.normal(ks[11], (VOCAB, D_BERT), jnp.float32)

    # deterministic example inputs (mirrors input_ids / attention_mask / cell_types)
    input_ids = jax.random.randint(ks[12], (N, S), 0, VOCAB, dtype=jnp.int32)
    lens = jax.random.randint(ks[13], (N, 1), 4, S + 1, dtype=jnp.int32)
    attention_mask = (jnp.arange(S)[None, :] < lens).astype(jnp.int32)
    cell_types = jax.random.randint(ks[14], (N,), 0, 2, dtype=jnp.int32)

    # synthetic stand-ins for the two pretrained encoders' pre-pooler states
    pooled_code = synthetic_pre_pooler(
        code_tok_table, input_ids, attention_mask).astype(jnp.bfloat16)
    pooled_text = synthetic_pre_pooler(
        text_tok_table, input_ids, attention_mask).astype(jnp.bfloat16)

    scores = jax.jit(functools.partial(head_pallas, params=params))(
        cell_types, pooled_code, pooled_text)
    scores = jax.block_until_ready(scores)

    ref = reference(cell_types, pooled_code, pooled_text, params)
    assert scores.shape == (N,)
    assert jnp.allclose(scores, ref, rtol=1e-3, atol=1e-3), (scores, ref)

    print("KERNEL_OK")
</pallas_src>

<mosaic_0001>
module attributes {stable_mosaic.version = 11 : i64} {
  func.func @head_kernel(%arg0: i32, %arg1: memref<16x1xi32, #tpu.memory_space<vmem>>, %arg2: memref<16x256xbf16, #tpu.memory_space<vmem>>, %arg3: memref<16x256xbf16, #tpu.memory_space<vmem>>, %arg4: memref<256x768xbf16, #tpu.memory_space<vmem>>, %arg5: memref<1x768xf32, #tpu.memory_space<vmem>>, %arg6: memref<256x768xbf16, #tpu.memory_space<vmem>>, %arg7: memref<1x768xf32, #tpu.memory_space<vmem>>, %arg8: memref<768x768xbf16, #tpu.memory_space<vmem>>, %arg9: memref<2x768xf32, #tpu.memory_space<vmem>>, %arg10: memref<1x768xf32, #tpu.memory_space<vmem>>, %arg11: memref<1x1xf32, #tpu.memory_space<vmem>>, %arg12: memref<16x1xf32, #tpu.memory_space<vmem>>, %arg13: memref<16x768xf32, #tpu.memory_space<vmem>>, %arg14: memref<16x768xf32, #tpu.memory_space<vmem>>) attributes {dimension_semantics = [#tpu.dimension_semantics<arbitrary>], iteration_bounds = array<i64: 3>, scalar_prefetch = 0 : i64, scratch_operands = 2 : i64, tpu.core_type = #tpu.core_type<tc>, window_params = [{pipeline_mode = #tpu.pipeline_mode<synchronous>, transform_indices = @transform_0, window_bounds = array<i64: 16, 1>}, {transform_indices = @transform_1, window_bounds = array<i64: 16, 256>}, {transform_indices = @transform_2, window_bounds = array<i64: 16, 256>}, {transform_indices = @transform_3, window_bounds = array<i64: 256, 768>}, {pipeline_mode = #tpu.pipeline_mode<synchronous>, transform_indices = @transform_4, window_bounds = array<i64: 1, 768>}, {transform_indices = @transform_5, window_bounds = array<i64: 256, 768>}, {pipeline_mode = #tpu.pipeline_mode<synchronous>, transform_indices = @transform_6, window_bounds = array<i64: 1, 768>}, {pipeline_mode = #tpu.pipeline_mode<synchronous>, transform_indices = @transform_7, window_bounds = array<i64: 768, 768>}, {pipeline_mode = #tpu.pipeline_mode<synchronous>, transform_indices = @transform_8, window_bounds = array<i64: 2, 768>}, {pipeline_mode = #tpu.pipeline_mode<synchronous>, transform_indices = @transform_9, window_bounds = array<i64: 1, 768>}, {pipeline_mode = #tpu.pipeline_mode<synchronous>, transform_indices = @transform_10, window_bounds = array<i64: 1, 1>}, {pipeline_mode = #tpu.pipeline_mode<synchronous>, transform_indices = @transform_11, window_bounds = array<i64: 16, 1>}]} {
    %c0_i32 = arith.constant 0 : i32
    %0 = arith.cmpi eq, %arg0, %c0_i32 : i32
    %1 = arith.extui %0 : i1 to i32
    %c0_i32_0 = arith.constant 0 : i32
    %2 = arith.cmpi ne, %1, %c0_i32_0 : i32
    scf.if %2 {
      %cst_18 = arith.constant 0.000000e+00 : f32
      %18 = vector.broadcast %cst_18 : f32 to vector<16x768xf32>
      %c0_19 = arith.constant 0 : index
      %c0_20 = arith.constant 0 : index
      %19 = vector.load %arg13[%c0_19, %c0_20] : memref<16x768xf32, #tpu.memory_space<vmem>>, vector<16x768xf32>
      tpu.vector_store %arg13[%c0_19, %c0_20], %18 {strides = array<i32>} : memref<16x768xf32, #tpu.memory_space<vmem>>, vector<16x768xf32>,
      %cst_21 = arith.constant 0.000000e+00 : f32
      %20 = vector.broadcast %cst_21 : f32 to vector<16x768xf32>
      %c0_22 = arith.constant 0 : index
      %c0_23 = arith.constant 0 : index
      %21 = vector.load %arg14[%c0_22, %c0_23] : memref<16x768xf32, #tpu.memory_space<vmem>>, vector<16x768xf32>
      tpu.vector_store %arg14[%c0_22, %c0_23], %20 {strides = array<i32>} : memref<16x768xf32, #tpu.memory_space<vmem>>, vector<16x768xf32>,
    } else {
    }
    %c0 = arith.constant 0 : index
    %c0_1 = arith.constant 0 : index
    %3 = vector.load %arg13[%c0, %c0_1] : memref<16x768xf32, #tpu.memory_space<vmem>>, vector<16x768xf32>
    %c0_2 = arith.constant 0 : index
    %c0_3 = arith.constant 0 : index
    %4 = vector.load %arg2[%c0_2, %c0_3] : memref<16x256xbf16, #tpu.memory_space<vmem>>, vector<16x256xbf16>
    %c0_4 = arith.constant 0 : index
    %c0_5 = arith.constant 0 : index
    %5 = vector.load %arg4[%c0_4, %c0_5] : memref<256x768xbf16, #tpu.memory_space<vmem>>, vector<256x768xbf16>
    %cst = arith.constant dense<0.000000e+00> : vector<16x768xf32>
    %6 = tpu.matmul %4, %5, %cst {dimension_numbers = #tpu.dot_dimension_numbers<[1], [0], [0], [1], [0, 0, 1, 1], [], []>} : vector<16x256xbf16>, vector<256x768xbf16>, vector<16x768xf32> -> vector<16x768xf32>
    %7 = arith.addf %3, %6 : vector<16x768xf32>
    %c0_6 = arith.constant 0 : index
    %c0_7 = arith.constant 0 : index
    %8 = vector.load %arg13[%c0_6, %c0_7] : memref<16x768xf32, #tpu.memory_space<vmem>>, vector<16x768xf32>
    tpu.vector_store %arg13[%c0_6, %c0_7], %7 {strides = array<i32>} : memref<16x768xf32, #tpu.memory_space<vmem>>, vector<16x768xf32>,
    %c0_8 = arith.constant 0 : index
    %c0_9 = arith.constant 0 : index
    %9 = vector.load %arg14[%c0_8, %c0_9] : memref<16x768xf32, #tpu.memory_space<vmem>>, vector<16x768xf32>
    %c0_10 = arith.constant 0 : index
    %c0_11 = arith.constant 0 : index
    %10 = vector.load %arg3[%c0_10, %c0_11] : memref<16x256xbf16, #tpu.memory_space<vmem>>, vector<16x256xbf16>
    %c0_12 = arith.constant 0 : index
    %c0_13 = arith.constant 0 : index
    %11 = vector.load %arg6[%c0_12, %c0_13] : memref<256x768xbf16, #tpu.memory_space<vmem>>, vector<256x768xbf16>
    %cst_14 = arith.constant dense<0.000000e+00> : vector<16x768xf32>
    %12 = tpu.matmul %10, %11, %cst_14 {dimension_numbers = #tpu.dot_dimension_numbers<[1], [0], [0], [1], [0, 0, 1, 1], [], []>} : vector<16x256xbf16>, vector<256x768xbf16>, vector<16x768xf32> -> vector<16x768xf32>
    %13 = arith.addf %9, %12 : vector<16x768xf32>
    %c0_15 = arith.constant 0 : index
    %c0_16 = arith.constant 0 : index
    %14 = vector.load %arg14[%c0_15, %c0_16] : memref<16x768xf32, #tpu.memory_space<vmem>>, vector<16x768xf32>
    tpu.vector_store %arg14[%c0_15, %c0_16], %13 {strides = array<i32>} : memref<16x768xf32, #tpu.memory_space<vmem>>, vector<16x768xf32>,
    %c2_i32 = arith.constant 2 : i32
    %15 = arith.cmpi eq, %arg0, %c2_i32 : i32
    %16 = arith.extui %15 : i1 to i32
    %c0_i32_17 = arith.constant 0 : i32
    %17 = arith.cmpi ne, %16, %c0_i32_17 : i32
    scf.if %17 {
      %c0_18 = arith.constant 0 : index
      %c0_19 = arith.constant 0 : index
      %18 = vector.load %arg1[%c0_18, %c0_19] : memref<16x1xi32, #tpu.memory_space<vmem>>, vector<16x1xi32>
      %c1_i32 = arith.constant 1 : i32
      %19 = vector.broadcast %c1_i32 : i32 to vector<16x1xi32>
      %20 = arith.cmpi eq, %18, %19 : vector<16x1xi32>
      %c0_20 = arith.constant 0 : index
      %c0_21 = arith.constant 0 : index
      %21 = vector.load %arg13[%c0_20, %c0_21] : memref<16x768xf32, #tpu.memory_space<vmem>>, vector<16x768xf32>
      %c0_22 = arith.constant 0 : index
      %c0_23 = arith.constant 0 : index
      %22 = vector.load %arg5[%c0_22, %c0_23] : memref<1x768xf32, #tpu.memory_space<vmem>>, vector<1x768xf32>
      %23 = vector.broadcast %22 : vector<1x768xf32> to vector<16x768xf32>
      %24 = arith.addf %21, %23 : vector<16x768xf32>
      %25 = math.tanh %24 : vector<16x768xf32>
      %c0_24 = arith.constant 0 : index
      %c0_25 = arith.constant 0 : index
      %26 = vector.load %arg14[%c0_24, %c0_25] : memref<16x768xf32, #tpu.memory_space<vmem>>, vector<16x768xf32>
      %c0_26 = arith.constant 0 : index
      %c0_27 = arith.constant 0 : index
      %27 = vector.load %arg7[%c0_26, %c0_27] : memref<1x768xf32, #tpu.memory_space<vmem>>, vector<1x768xf32>
      %28 = vector.broadcast %27 : vector<1x768xf32> to vector<16x768xf32>
      %29 = arith.addf %26, %28 : vector<16x768xf32>
      %30 = math.tanh %29 : vector<16x768xf32>
      %31 = vector.shape_cast %20 : vector<16x1xi1> to vector<16x1xi1>
      %32 = vector.broadcast %31 : vector<16x1xi1> to vector<16x768xi1>
      %33 = arith.select %32, %25, %30 : vector<16x768xi1>, vector<16x768xf32>
      %34 = arith.truncf %33 : vector<16x768xf32> to vector<16x768xbf16>
      %c0_28 = arith.constant 0 : index
      %c0_29 = arith.constant 0 : index
      %35 = vector.load %arg8[%c0_28, %c0_29] : memref<768x768xbf16, #tpu.memory_space<vmem>>, vector<768x768xbf16>
      %cst_30 = arith.constant dense<0.000000e+00> : vector<16x768xf32>
      %36 = tpu.matmul %34, %35, %cst_30 {dimension_numbers = #tpu.dot_dimension_numbers<[1], [0], [0], [1], [0, 0, 1, 1], [], []>} : vector<16x768xbf16>, vector<768x768xbf16>, vector<16x768xf32> -> vector<16x768xf32>
      %c1 = arith.constant 1 : index
      %c0_31 = arith.constant 0 : index
      %37 = vector.load %arg9[%c1, %c0_31] : memref<2x768xf32, #tpu.memory_space<vmem>>, vector<1x768xf32>
      %c0_32 = arith.constant 0 : index
      %c0_33 = arith.constant 0 : index
      %38 = vector.load %arg9[%c0_32, %c0_33] : memref<2x768xf32, #tpu.memory_space<vmem>>, vector<1x768xf32>
      %39 = vector.shape_cast %20 : vector<16x1xi1> to vector<16x1xi1>
      %40 = vector.broadcast %39 : vector<16x1xi1> to vector<16x768xi1>
      %41 = vector.shape_cast %37 : vector<1x768xf32> to vector<1x768xf32>
      %42 = vector.broadcast %41 : vector<1x768xf32> to vector<16x768xf32>
      %43 = vector.shape_cast %38 : vector<1x768xf32> to vector<1x768xf32>
      %44 = vector.broadcast %43 : vector<1x768xf32> to vector<16x768xf32>
      %45 = arith.select %40, %42, %44 : vector<16x768xi1>, vector<16x768xf32>
      %46 = arith.addf %36, %45 : vector<16x768xf32>
      %cst_34 = arith.constant 0.000000e+00 : f32
      %47 = vector.broadcast %cst_34 : f32 to vector<16x768xf32>
      %48 = arith.maximumf %46, %47 : vector<16x768xf32>
      %c0_35 = arith.constant 0 : index
      %c0_36 = arith.constant 0 : index
      %49 = vector.load %arg10[%c0_35, %c0_36] : memref<1x768xf32, #tpu.memory_space<vmem>>, vector<1x768xf32>
      %50 = vector.broadcast %49 : vector<1x768xf32> to vector<16x768xf32>
      %51 = arith.mulf %48, %50 : vector<16x768xf32>
      %cst_37 = arith.constant dense<0.000000e+00> : vector<16xf32>
      %52 = vector.multi_reduction <add>, %51, %cst_37 [1] : vector<16x768xf32> to vector<16xf32>
      %53 = vector.shape_cast %52 : vector<16xf32> to vector<16x1xf32>
      %c0_38 = arith.constant 0 : index
      %c0_39 = arith.constant 0 : index
      %54 = vector.load %arg11[%c0_38, %c0_39] : memref<1x1xf32, #tpu.memory_space<vmem>>, vector<1x1xf32>
      %55 = vector.broadcast %54 : vector<1x1xf32> to vector<16x1xf32>
      %56 = arith.addf %53, %55 : vector<16x1xf32>
      %c0_40 = arith.constant 0 : index
      %c0_41 = arith.constant 0 : index
      %57 = vector.load %arg12[%c0_40, %c0_41] : memref<16x1xf32, #tpu.memory_space<vmem>>, vector<16x1xf32>
      tpu.vector_store %arg12[%c0_40, %c0_41], %56 {strides = array<i32>} : memref<16x1xf32, #tpu.memory_space<vmem>>, vector<16x1xf32>,
    } else {
    }
    return
  }
  func.func @transform_0(%arg0: i32) -> (i32, i32) {
    %c0_i32 = arith.constant 0 : i32
    %c0_i32_0 = arith.constant 0 : i32
    %c0_i32_1 = arith.constant 0 : i32
    return %c0_i32, %c0_i32_0 : i32, i32
  }
  func.func @transform_1(%arg0: i32) -> (i32, i32) {
    %c0_i32 = arith.constant 0 : i32
    %c0_i32_0 = arith.constant 0 : i32
    return %c0_i32, %arg0 : i32, i32
  }
  func.func @transform_2(%arg0: i32) -> (i32, i32) {
    %c0_i32 = arith.constant 0 : i32
    %c0_i32_0 = arith.constant 0 : i32
    return %c0_i32, %arg0 : i32, i32
  }
  func.func @transform_3(%arg0: i32) -> (i32, i32) {
    %c0_i32 = arith.constant 0 : i32
    %c0_i32_0 = arith.constant 0 : i32
    return %arg0, %c0_i32 : i32, i32
  }
  func.func @transform_4(%arg0: i32) -> (i32, i32) {
    %c0_i32 = arith.constant 0 : i32
    %c0_i32_0 = arith.constant 0 : i32
    %c0_i32_1 = arith.constant 0 : i32
    return %c0_i32, %c0_i32_0 : i32, i32
  }
  func.func @transform_5(%arg0: i32) -> (i32, i32) {
    %c0_i32 = arith.constant 0 : i32
    %c0_i32_0 = arith.constant 0 : i32
    return %arg0, %c0_i32 : i32, i32
  }
  func.func @transform_6(%arg0: i32) -> (i32, i32) {
    %c0_i32 = arith.constant 0 : i32
    %c0_i32_0 = arith.constant 0 : i32
    %c0_i32_1 = arith.constant 0 : i32
    return %c0_i32, %c0_i32_0 : i32, i32
  }
  func.func @transform_7(%arg0: i32) -> (i32, i32) {
    %c0_i32 = arith.constant 0 : i32
    %c0_i32_0 = arith.constant 0 : i32
    %c0_i32_1 = arith.constant 0 : i32
    return %c0_i32, %c0_i32_0 : i32, i32
  }
  func.func @transform_8(%arg0: i32) -> (i32, i32) {
    %c0_i32 = arith.constant 0 : i32
    %c0_i32_0 = arith.constant 0 : i32
    %c0_i32_1 = arith.constant 0 : i32
    return %c0_i32, %c0_i32_0 : i32, i32
  }
  func.func @transform_9(%arg0: i32) -> (i32, i32) {
    %c0_i32 = arith.constant 0 : i32
    %c0_i32_0 = arith.constant 0 : i32
    %c0_i32_1 = arith.constant 0 : i32
    return %c0_i32, %c0_i32_0 : i32, i32
  }
  func.func @transform_10(%arg0: i32) -> (i32, i32) {
    %c0_i32 = arith.constant 0 : i32
    %c0_i32_0 = arith.constant 0 : i32
    %c0_i32_1 = arith.constant 0 : i32
    return %c0_i32, %c0_i32_0 : i32, i32
  }
  func.func @transform_11(%arg0: i32) -> (i32, i32) {
    %c0_i32 = arith.constant 0 : i32
    %c0_i32_0 = arith.constant 0 : i32
    %c0_i32_1 = arith.constant 0 : i32
    return %c0_i32, %c0_i32_0 : i32, i32
  }
}

</mosaic_0001>

<bundles_post_ra>
// kernel: head_pallas.1
= control target key start
LH: loop header
LB: loop body
LE: loop exit
PB: predicated region body
PF: predicated region fallthrough
CT: control target
= control target key end

     0   :  { %s7361_s0 = inlined_call_operand.vmem [shape: s32[16,1], index: 0, kind: input, shape index: {}]   ;;  %s7362_s1 = inlined_call_operand.vmem [shape: bf16[16,768], index: 1, kind: input, shape index: {}]   ;;  %s7363_s2 = inlined_call_operand.vmem [shape: bf16[16,768], index: 2, kind: input, shape index: {}]   ;;  %s7364_s3 = inlined_call_operand.vmem [shape: bf16[768,768], index: 3, kind: input, shape index: {}]   ;;  %s7365_s4 = inlined_call_operand.vmem [shape: f32[1,768], index: 4, kind: input, shape index: {}]   ;;  %s7366_s5 = inlined_call_operand.vmem [shape: bf16[768,768], index: 5, kind: input, shape index: {}]   ;;  %s7367_s6 = inlined_call_operand.vmem [shape: f32[1,768], index: 6, kind: input, shape index: {}]   ;;  %s7368_s7 = inlined_call_operand.vmem [shape: bf16[768,768], index: 7, kind: input, shape index: {}]   ;;  %s7369_s8 = inlined_call_operand.vmem [shape: f32[2,768], index: 8, kind: input, shape index: {}]   ;;  %s7370_s9 = inlined_call_operand.vmem [shape: f32[1,768], index: 9, kind: input, shape index: {}]   ;;  %s7371_s10 = inlined_call_operand.<no memory space> [shape: f32[1,1], index: 10, kind: input, shape index: {}]   ;;  %s7372_s11 = inlined_call_operand.vmem [shape: f32[16,1], index: 11, kind: output, shape index: {}]  }
   0x1   :  { %v16_v0 = vstv %s7371_s10 }
   0x2   :  { %17 = vst [vmem:[#allocation4] sm:$0x1] %v16_v0 }
   0x3   :  { %s6015_s19 = smov 0   ;;  %s6017_s20 = smov 0  }
   0x4   :  { %s6019_s21 = smov 0  }
   0x5 LB: > { %s6031_s10 = sadd.s32 4294967295, %s5948_s21   ;;  %s6034_s22 = sadd.s32 1, %s5948_s21   ;;  %s5948_s21 = sphi %s6019_s21, %s7376_s21   ;;  %s5944_s20 = sphi %s6017_s20, %s7375_s20   ;;  %s5940_s19 = sphi %s6015_s19, %s7374_s19  }
   0x6   : > { %s48_s23 = ssub.s32 %s5948_s21, %s6034_s22  ;;  %s51_s24 = sadd.s32 1, %s5944_s20 }
   0x7   : > { %p49_p0 = scmp.eq.s32.totalorder %s48_s23, 0  ;;  %p58_p1 = scmp.ne.s32.totalorder %s5944_s20, %s5940_s19 }
   0x8   : > { %p59_p2 = scmp.eq.s32.totalorder %s5948_s21, 0  ;;  %p4582_p4 = scmp.ge.s32.totalorder %s5948_s21, 3 }
   0x9   : > { %s6043_s25 = scalar_select %p49_p0, %s5944_s20, %s51_s24  }
   0xa   : > { %p6045_p3 = por %p59_p2, %p58_p1  ;;  %330 = sbr.rel (%p4582_p4) target bundleno = 31 (0x1f), region = 44 }
  0x11   : > { %333 = sbr.rel (!%p6045_p3) target bundleno = 24 (0x18), region = 48  ;;  %s335_s27 = sand.u32 (%p6045_p3), 1, %s5944_s20  }
  0x12   : > { %s5086_s28 = sshll.u32 (%p6045_p3), %s5948_s21, 3  ;;  %s4583_s29 = sshll.u32 (%p6045_p3), %s335_s27, 4 }
  0x13   : > { %s340_s13 = scalar_lea.vmem (%p6045_p3), %s7362_s1, %s5086_s28  ;;  %s337_s14 = scalar_lea.vmem (%p6045_p3), [#allocation5], %s4583_s29 }
  0x14   : > { %v370_v1 = vld [vmem:[%s340_s13] sm:$0xff] (%p6045_p3)  ;;  %v372_v2 = vld [vmem:[%s340_s13 + $0x18] sm:$0xff] (%p6045_p3) }
  0x15   : > { %371 = vst [vmem:[%s337_s14] sm:$0xff] (%p6045_p3), %v370_v1  ;;  %373 = vst [vmem:[%s337_s14 + $0x8] sm:$0xff] (%p6045_p3), %v372_v2 }
  0x18 PF: > { %379 = sbr.rel (!%p6045_p3) target bundleno = 31 (0x1f), region = 86  ;;  %s381_s15 = sand.u32 (%p6045_p3), 1, %s5944_s20  }
  0x19   : > { %s5087_s16 = sshll.u32 (%p6045_p3), %s5948_s21, 3  ;;  %s4586_s17 = sshll.u32 (%p6045_p3), %s381_s15, 4 }
  0x1a   : > { %s386_s24 = scalar_lea.vmem (%p6045_p3), %s7363_s2, %s5087_s16  ;;  %s383_s27 = scalar_lea.vmem (%p6045_p3), [#allocation6], %s4586_s17 }
  0x1b   : > { %v416_v3 = vld [vmem:[%s386_s24] sm:$0xff] (%p6045_p3)  ;;  %v418_v4 = vld [vmem:[%s386_s24 + $0x18] sm:$0xff] (%p6045_p3) }
  0x1c   : > { %417 = vst [vmem:[%s383_s27] sm:$0xff] (%p6045_p3), %v416_v3  ;;  %419 = vst [vmem:[%s383_s27 + $0x8] sm:$0xff] (%p6045_p3), %v418_v4 }
  0x1f PF: > { %p4589_p5 = scmp.ge.s32.totalorder %s5948_s21, 1  ;;  %p444_p6 = scmp.lt.s32.totalorder %s5948_s21, 4 }
  0x21   : > { %p445_p7 = pnand %p4589_p5, %p444_p6 }
  0x22   : > { %s451_s26 = sand.u32 (!%p445_p7), 1, %s5940_s19   ;;  %s4592_s28 = sshll.u32 (!%p445_p7), %s6031_s10, 5 }
  0x23   : > { %448 = sbr.rel (%p445_p7) target bundleno = 1133 (0x46d), region = 132  ;;  %s6068_s29 = sshll.u32 (!%p445_p7), %s451_s26, 4 }
  0x24   : > { %p511_p8 = scmp.lt.s32.totalorder (!%p445_p7), %s4592_s28, 95  ;;  %s453_s17 = scalar_lea.vmem (!%p445_p7), [#allocation5], %s6068_s29 }
  0x25   : > { %s460_s19 = scalar_lea.vmem (!%p445_p7), [#allocation6], %s6068_s29  ;;  %p4596_p9 = scmp.ne.s32.totalorder (!%p445_p7), %s6031_s10, 0 }
  0x2a   : > { %s7378_s28 = smov (!%p511_p8, %s4592_s28), 95  ;;  %527 = sbr.rel (%p4596_p9) target bundleno = 56 (0x38), region = 144 }
  0x2b   : > { %s5124_s30 = smul.u32 24, %s7378_s28  ;;  %v5950_v5 = vmov (!%p4596_p9), 0.0  }
  0x2c   : > { %528 = vst [vmem:[#allocation2] sm:$0xff] (!%p4596_p9), %v5950_v5  ;;  %529 = vst [vmem:[#allocation2 + $0x8] sm:$0xff] (!%p4596_p9), %v5950_v5 }
  0x2d   : > { %s6073_s14 = scalar_lea.vmem %s7364_s3, %s5124_s30  ;;  %s6078_s16 = scalar_lea.vmem %s7366_s5, %s5124_s30  ;;  %530 = vst [vmem:[#allocation2 + $0x10] sm:$0xff] (!%p4596_p9), %v5950_v5  ;;  %531 = vst [vmem:[#allocation2 + $0x18] sm:$0xff] (!%p4596_p9), %v5950_v5 }
  0x2e   : > { %532 = vst [vmem:[#allocation2 + $0x20] sm:$0xff] (!%p4596_p9), %v5950_v5  ;;  %533 = vst [vmem:[#allocation2 + $0x28] sm:$0xff] (!%p4596_p9), %v5950_v5 }
  0x2f   : > { %534 = vst [vmem:[#allocation2 + $0x30] sm:$0xff] (!%p4596_p9), %v5950_v5  ;;  %535 = vst [vmem:[#allocation2 + $0x38] sm:$0xff] (!%p4596_p9), %v5950_v5 }
  0x30   : > { %536 = vst [vmem:[#allocation2 + $0x40] sm:$0xff] (!%p4596_p9), %v5950_v5  ;;  %537 = vst [vmem:[#allocation2 + $0x48] sm:$0xff] (!%p4596_p9), %v5950_v5 }
  0x31   : > { %538 = vst [vmem:[#allocation2 + $0x50] sm:$0xff] %v5950_v5  ;;  %539 = vst [vmem:[#allocation2 + $0x58] sm:$0xff] %v5950_v5 }
  0x32   : > { %540 = vst [vmem:[#allocation3] sm:$0xff] %v5950_v5  ;;  %541 = vst [vmem:[#allocation3 + $0x8] sm:$0xff] %v5950_v5 }
  0x33   : > { %542 = vst [vmem:[#allocation3 + $0x10] sm:$0xff] %v5950_v5  ;;  %543 = vst [vmem:[#allocation3 + $0x18] sm:$0xff] %v5950_v5 }
  0x34   : > { %544 = vst [vmem:[#allocation3 + $0x20] sm:$0xff] %v5950_v5  ;;  %545 = vst [vmem:[#allocation3 + $0x28] sm:$0xff] %v5950_v5 }
  0x35   : > { %546 = vst [vmem:[#allocation3 + $0x30] sm:$0xff] %v5950_v5  ;;  %547 = vst [vmem:[#allocation3 + $0x38] sm:$0xff] %v5950_v5 }
  0x36   : > { %548 = vst [vmem:[#allocation3 + $0x40] sm:$0xff] %v5950_v5  ;;  %549 = vst [vmem:[#allocation3 + $0x48] sm:$0xff] %v5950_v5 }
  0x37   : > { %550 = vst [vmem:[#allocation3 + $0x50] sm:$0xff] %v5950_v5  ;;  %551 = vst [vmem:[#allocation3 + $0x58] sm:$0xff] %v5950_v5 }
  0x38 PF: > { %v5151_v6 = vld [vmem:[%s6073_s14 + $0x4] ss:$24 sps:$4 sm:$0xff]   ;;  %v5155_v8 = vld [vmem:[%s6073_s14] ss:$24 sps:$4 sm:$0xff]   ;;  %v5157_v10 = vld [vmem:[%s6073_s14 + $0x34] ss:$24 sps:$4 sm:$0xff]  }
  0x39   : > { %v5153_v7 = vld [vmem:[%s6073_s14 + $0xc] ss:$24 sps:$4 sm:$0xff]   ;;  %1152 = vmatprep.subr.bf16.mxu0 %v5151_v6  ;;  %v5156_v9 = vld [vmem:[%s6073_s14 + $0x8] ss:$24 sps:$4 sm:$0xff]   ;;  %v5159_v11 = vld [vmem:[%s6073_s14 + $0x3c] ss:$24 sps:$4 sm:$0xff]  }
  0x3a   : > { %1195 = vmatprep.subr.bf16.mxu1 %v5153_v7  ;;  %1153 = vmatpush1.bf16.msra.mxu0 %v5155_v8  ;;  %v5161_v12 = vld [vmem:[%s6073_s14 + $0x30] ss:$24 sps:$4 sm:$0xff]   ;;  %v5163_v14 = vld [vmem:[%s6073_s14 + $0x64] ss:$24 sps:$4 sm:$0xff]   ;;  %v5167_v16 = vld [vmem:[%s6073_s14 + $0x60] ss:$24 sps:$4 sm:$0xff]  }
  0x3b   : > { %1196 = vmatpush1.bf16.msra.mxu1 %v5156_v9  ;;  %1154 = vmatprep.subr.bf16.mxu0 %v5157_v10  ;;  %v5162_v13 = vld [vmem:[%s6073_s14 + $0x38] ss:$24 sps:$4 sm:$0xff]   ;;  %v5165_v15 = vld [vmem:[%s6073_s14 + $0x6c] ss:$24 sps:$4 sm:$0xff]   ;;  %v5168_v17 = vld [vmem:[%s6073_s14 + $0x68] ss:$24 sps:$4 sm:$0xff]  }
  0x3c   : > { %1197 = vmatprep.subr.bf16.mxu1 %v5159_v11  ;;  %v5169_v18 = vld [vmem:[%s6073_s14 + $0x94] ss:$24 sps:$4 sm:$0xff]   ;;  %v5173_v20 = vld [vmem:[%s6073_s14 + $0x90] ss:$24 sps:$4 sm:$0xff]   ;;  %v5175_v22 = vld [vmem:[%s6073_s14 + $0xc4] ss:$24 sps:$4 sm:$0xff]  }
  0x3d   : > { %v5171_v19 = vld [vmem:[%s6073_s14 + $0x9c] ss:$24 sps:$4 sm:$0xff]   ;;  %v5174_v21 = vld [vmem:[%s6073_s14 + $0x98] ss:$24 sps:$4 sm:$0xff]   ;;  %v5177_v23 = vld [vmem:[%s6073_s14 + $0xcc] ss:$24 sps:$4 sm:$0xff]  }
  0x3e   : > { %1155 = vmatpush1.bf16.msra.mxu0 %v5161_v12  ;;  %v5179_v24 = vld [vmem:[%s6073_s14 + $0xc0] ss:$24 sps:$4 sm:$0xff]   ;;  %v5181_v26 = vld [vmem:[%s6073_s14 + $0xf4] ss:$24 sps:$4 sm:$0xff]   ;;  %v5185_v28 = vld [vmem:[%s6073_s14 + $0xf0] ss:$24 sps:$4 sm:$0xff]  }
  0x3f   : > { %1198 = vmatpush1.bf16.msra.mxu1 %v5162_v13  ;;  %1156 = vmatprep.subr.bf16.mxu0 %v5163_v14  ;;  %v5180_v25 = vld [vmem:[%s6073_s14 + $0xc8] ss:$24 sps:$4 sm:$0xff]   ;;  %v5183_v27 = vld [vmem:[%s6073_s14 + $0xfc] ss:$24 sps:$4 sm:$0xff]   ;;  %v5186_v29 = vld [vmem:[%s6073_s14 + $0xf8] ss:$24 sps:$4 sm:$0xff]  }
  0x40   : > { %1199 = vmatprep.subr.bf16.mxu1 %v5165_v15  ;;  %v5187_v30 = vld [vmem:[%s6073_s14 + $0x124] ss:$24 sps:$4 sm:$0xff]   ;;  %v5191_v32 = vld [vmem:[%s6073_s14 + $0x120] ss:$24 sps:$4 sm:$0xff]   ;;  %v5193_v34 = vld [vmem:[%s6073_s14 + $0x154] ss:$24 sps:$4 sm:$0xff]  }
  0x41   : > { %v5189_v31 = vld [vmem:[%s6073_s14 + $0x12c] ss:$24 sps:$4 sm:$0xff]   ;;  %v5192_v33 = vld [vmem:[%s6073_s14 + $0x128] ss:$24 sps:$4 sm:$0xff]   ;;  %v5195_v35 = vld [vmem:[%s6073_s14 + $0x15c] ss:$24 sps:$4 sm:$0xff]  }
  0x42   : > { %1157 = vmatpush1.bf16.msra.mxu0 %v5167_v16  ;;  %v5197_v36 = vld [vmem:[%s6073_s14 + $0x150] ss:$24 sps:$4 sm:$0xff]   ;;  %v5199_v38 = vld [vmem:[%s6073_s14 + $0x184] ss:$24 sps:$4 sm:$0xff]   ;;  %v5203_v40 = vld [vmem:[%s6073_s14 + $0x180] ss:$24 sps:$4 sm:$0xff]  }
  0x43   : > { %1200 = vmatpush1.bf16.msra.mxu1 %v5168_v17  ;;  %1158 = vmatprep.subr.bf16.mxu0 %v5169_v18  ;;  %v5198_v37 = vld [vmem:[%s6073_s14 + $0x158] ss:$24 sps:$4 sm:$0xff]   ;;  %v5201_v39 = vld [vmem:[%s6073_s14 + $0x18c] ss:$24 sps:$4 sm:$0xff]   ;;  %v5204_v41 = vld [vmem:[%s6073_s14 + $0x188] ss:$24 sps:$4 sm:$0xff]  }
  0x44   : > { %1201 = vmatprep.subr.bf16.mxu1 %v5171_v19  ;;  %v5205_v42 = vld [vmem:[%s6073_s14 + $0x1b4] ss:$24 sps:$4 sm:$0xff]   ;;  %v5209_v44 = vld [vmem:[%s6073_s14 + $0x1b0] ss:$24 sps:$4 sm:$0xff]   ;;  %v5211_v46 = vld [vmem:[%s6073_s14 + $0x1e4] ss:$24 sps:$4 sm:$0xff]  }
  0x45   : > { %v5207_v43 = vld [vmem:[%s6073_s14 + $0x1bc] ss:$24 sps:$4 sm:$0xff]   ;;  %v5210_v45 = vld [vmem:[%s6073_s14 + $0x1b8] ss:$24 sps:$4 sm:$0xff]   ;;  %v5213_v47 = vld [vmem:[%s6073_s14 + $0x1ec] ss:$24 sps:$4 sm:$0xff]  }
  0x46   : > { %1159 = vmatpush1.bf16.msra.mxu0 %v5173_v20  ;;  %v5215_v48 = vld [vmem:[%s6073_s14 + $0x1e0] ss:$24 sps:$4 sm:$0xff]   ;;  %v5217_v50 = vld [vmem:[%s6073_s14 + $0x214] ss:$24 sps:$4 sm:$0xff]   ;;  %v5221_v52 = vld [vmem:[%s6073_s14 + $0x210] ss:$24 sps:$4 sm:$0xff]  }
  0x47   : > { %1202 = vmatpush1.bf16.msra.mxu1 %v5174_v21  ;;  %1160 = vmatprep.subr.bf16.mxu0 %v5175_v22  ;;  %v5216_v49 = vld [vmem:[%s6073_s14 + $0x1e8] ss:$24 sps:$4 sm:$0xff]   ;;  %v5219_v51 = vld [vmem:[%s6073_s14 + $0x21c] ss:$24 sps:$4 sm:$0xff]   ;;  %v5222_v53 = vld [vmem:[%s6073_s14 + $0x218] ss:$24 sps:$4 sm:$0xff]  }
  0x48   : > { %1203 = vmatprep.subr.bf16.mxu1 %v5177_v23  ;;  %v5247_v54 = vld [vmem:[%s453_s17 + $0x4] ss:$8 sps:$4 sm:$0xff]   ;;  %v6153_v9 = vld [vmem:[%s453_s17] ss:$8 sps:$4 sm:$0xff]   ;;  %p4793_p10 = scmp.ne.s32.totalorder %s6031_s10, 2 }
  0x49   : > { %v5223_v55 = vld [vmem:[%s6073_s14 + $0x244] ss:$24 sps:$4 sm:$0xff]   ;;  %1184 = vmatprep.mubr.bf16.mxu0 %v5247_v54  ;;  %1227 = vmatprep.mubr.bf16.mxu1 %v5247_v54  ;;  %v5227_v57 = vld [vmem:[%s6073_s14 + $0x240] ss:$24 sps:$4 sm:$0xff]   ;;  %v5229_v59 = vld [vmem:[%s6073_s14 + $0x274] ss:$24 sps:$4 sm:$0xff]  }
  0x4a   : > { %1161 = vmatpush1.bf16.msra.mxu0 %v5179_v24  ;;  %v5225_v56 = vld [vmem:[%s6073_s14 + $0x24c] ss:$24 sps:$4 sm:$0xff]   ;;  %v5228_v58 = vld [vmem:[%s6073_s14 + $0x248] ss:$24 sps:$4 sm:$0xff]   ;;  %v5231_v60 = vld [vmem:[%s6073_s14 + $0x27c] ss:$24 sps:$4 sm:$0xff]  }
  0x4b   : > { %1204 = vmatpush1.bf16.msra.mxu1 %v5180_v25  ;;  %1162 = vmatprep.subr.bf16.mxu0 %v5181_v26  ;;  %v5233_v61 = vld [vmem:[%s6073_s14 + $0x270] ss:$24 sps:$4 sm:$0xff]   ;;  %v5235_v63 = vld [vmem:[%s6073_s14 + $0x2a4] ss:$24 sps:$4 sm:$0xff]   ;;  %v5239_v1 = vld [vmem:[%s6073_s14 + $0x2a0] ss:$24 sps:$4 sm:$0xff]  }
  0x4c   : > { %1205 = vmatprep.subr.bf16.mxu1 %v5183_v27  ;;  %v5234_v62 = vld [vmem:[%s6073_s14 + $0x278] ss:$24 sps:$4 sm:$0xff]   ;;  %v5237_v0 = vld [vmem:[%s6073_s14 + $0x2ac] ss:$24 sps:$4 sm:$0xff]   ;;  %v5240_v2 = vld [vmem:[%s6073_s14 + $0x2a8] ss:$24 sps:$4 sm:$0xff]  }
  0x4d   : > { %v5241_v3 = vld [vmem:[%s6073_s14 + $0x2d4] ss:$24 sps:$4 sm:$0xff]   ;;  %v5245_v5 = vld [vmem:[%s6073_s14 + $0x2d0] ss:$24 sps:$4 sm:$0xff]   ;;  %v5255_v8 = vld [vmem:[%s6078_s16 + $0x4] ss:$24 sps:$4 sm:$0xff]  }
  0x4e   : > { %1163 = vmatpush1.bf16.msra.mxu0 %v5185_v28  ;;  %v5243_v4 = vld [vmem:[%s6073_s14 + $0x2dc] ss:$24 sps:$4 sm:$0xff]   ;;  %v5246_v6 = vld [vmem:[%s6073_s14 + $0x2d8] ss:$24 sps:$4 sm:$0xff]   ;;  %vm4501_vm4 = vcmask (!%p4793_p10), 7168  }
  0x4f   : > { %1206 = vmatpush1.bf16.msra.mxu1 %v5186_v29  ;;  %1164 = vmatprep.subr.bf16.mxu0 %v5187_v30  ;;  %v5252_v7 = vld [vmem:[%s6073_s14 + $0x14] ss:$24 sps:$4 sm:$0xff]   ;;  %v5250_v10 = vld [vmem:[%s6073_s14 + $0x10] ss:$24 sps:$4 sm:$0xff]   ;;  %v5253_v11 = vld [vmem:[%s6078_s16] ss:$24 sps:$4 sm:$0xff]  }
  0x50   : > { %1207 = vmatprep.subr.bf16.mxu1 %v5189_v31  ;;  %v5258_v12 = vld [vmem:[%s6073_s14 + $0x44] ss:$24 sps:$4 sm:$0xff]   ;;  %v5261_v13 = vld [vmem:[%s6078_s16 + $0x34] ss:$24 sps:$4 sm:$0xff]   ;;  %v5256_v14 = vld [vmem:[%s6073_s14 + $0x40] ss:$24 sps:$4 sm:$0xff]  }
  0x51   : > { %v5259_v15 = vld [vmem:[%s6078_s16 + $0x30] ss:$24 sps:$4 sm:$0xff]   ;;  %v5264_v16 = vld [vmem:[%s6073_s14 + $0x74] ss:$24 sps:$4 sm:$0xff]   ;;  %v5267_v17 = vld [vmem:[%s6078_s16 + $0x64] ss:$24 sps:$4 sm:$0xff]  }
  0x52   : > { %1165 = vmatpush1.bf16.msra.mxu0 %v5191_v32  ;;  %v5262_v18 = vld [vmem:[%s6073_s14 + $0x70] ss:$24 sps:$4 sm:$0xff]   ;;  %v5265_v19 = vld [vmem:[%s6078_s16 + $0x60] ss:$24 sps:$4 sm:$0xff]   ;;  %v5270_v20 = vld [vmem:[%s6073_s14 + $0xa4] ss:$24 sps:$4 sm:$0xff]  }
  0x53   : > { %1208 = vmatpush1.bf16.msra.mxu1 %v5192_v33  ;;  %1166 = vmatprep.subr.bf16.mxu0 %v5193_v34  ;;  %v5273_v21 = vld [vmem:[%s6078_s16 + $0x94] ss:$24 sps:$4 sm:$0xff]   ;;  %v5268_v22 = vld [vmem:[%s6073_s14 + $0xa0] ss:$24 sps:$4 sm:$0xff]   ;;  %v5271_v23 = vld [vmem:[%s6078_s16 + $0x90] ss:$24 sps:$4 sm:$0xff]  }
  0x54   : > { %1209 = vmatprep.subr.bf16.mxu1 %v5195_v35  ;;  %v5276_v24 = vld [vmem:[%s6073_s14 + $0xd4] ss:$24 sps:$4 sm:$0xff]   ;;  %v5279_v25 = vld [vmem:[%s6078_s16 + $0xc4] ss:$24 sps:$4 sm:$0xff]   ;;  %v5274_v26 = vld [vmem:[%s6073_s14 + $0xd0] ss:$24 sps:$4 sm:$0xff]  }
  0x55   : > { %v5277_v27 = vld [vmem:[%s6078_s16 + $0xc0] ss:$24 sps:$4 sm:$0xff]   ;;  %v5282_v28 = vld [vmem:[%s6073_s14 + $0x104] ss:$24 sps:$4 sm:$0xff]   ;;  %v5285_v29 = vld [vmem:[%s6078_s16 + $0xf4] ss:$24 sps:$4 sm:$0xff]  }
  0x56   : > { %1167 = vmatpush1.bf16.msra.mxu0 %v5197_v36  ;;  %v5280_v30 = vld [vmem:[%s6073_s14 + $0x100] ss:$24 sps:$4 sm:$0xff]   ;;  %v5283_v31 = vld [vmem:[%s6078_s16 + $0xf0] ss:$24 sps:$4 sm:$0xff]   ;;  %v5288_v32 = vld [vmem:[%s6073_s14 + $0x134] ss:$24 sps:$4 sm:$0xff]  }
  0x57   : > { %1210 = vmatpush1.bf16.msra.mxu1 %v5198_v37  ;;  %1168 = vmatprep.subr.bf16.mxu0 %v5199_v38  ;;  %v5291_v33 = vld [vmem:[%s6078_s16 + $0x124] ss:$24 sps:$4 sm:$0xff]   ;;  %v5286_v34 = vld [vmem:[%s6073_s14 + $0x130] ss:$24 sps:$4 sm:$0xff]   ;;  %v5289_v35 = vld [vmem:[%s6078_s16 + $0x120] ss:$24 sps:$4 sm:$0xff]  }
  0x58   : > { %1211 = vmatprep.subr.bf16.mxu1 %v5201_v39  ;;  %v6185_v36 = vld [vmem:[%s460_s19 + $0x4] ss:$8 sps:$4 sm:$0xff]  }
  0x59   : > { %v5294_v37 = vld [vmem:[%s6073_s14 + $0x164] ss:$24 sps:$4 sm:$0xff]   ;;  %v5297_v38 = vld [vmem:[%s6078_s16 + $0x154] ss:$24 sps:$4 sm:$0xff]   ;;  %v5292_v39 = vld [vmem:[%s6073_s14 + $0x160] ss:$24 sps:$4 sm:$0xff]  }
  0x5a   : > { %1169 = vmatpush1.bf16.msra.mxu0 %v5203_v40  ;;  %v5295_v40 = vld [vmem:[%s6078_s16 + $0x150] ss:$24 sps:$4 sm:$0xff]  }
  0x5b   : > { %1212 = vmatpush1.bf16.msra.mxu1 %v5204_v41  ;;  %1170 = vmatprep.subr.bf16.mxu0 %v5205_v42  ;;  %v5300_v41 = vld [vmem:[%s6073_s14 + $0x194] ss:$24 sps:$4 sm:$0xff]   ;;  %v5303_v42 = vld [vmem:[%s6078_s16 + $0x184] ss:$24 sps:$4 sm:$0xff]  }
  0x5c   : > { %1213 = vmatprep.subr.bf16.mxu1 %v5207_v43  ;;  %v5298_v43 = vld [vmem:[%s6073_s14 + $0x190] ss:$24 sps:$4 sm:$0xff]  }
  0x5e   : > { %1171 = vmatpush1.bf16.msra.mxu0 %v5209_v44  ;;  %v5301_v44 = vld [vmem:[%s6078_s16 + $0x180] ss:$24 sps:$4 sm:$0xff]  }
  0x5f   : > { %1214 = vmatpush1.bf16.msra.mxu1 %v5210_v45  ;;  %1172 = vmatprep.subr.bf16.mxu0 %v5211_v46  ;;  %v5306_v45 = vld [vmem:[%s6073_s14 + $0x1c4] ss:$24 sps:$4 sm:$0xff]   ;;  %v5309_v46 = vld [vmem:[%s6078_s16 + $0x1b4] ss:$24 sps:$4 sm:$0xff]  }
  0x60   : > { %1215 = vmatprep.subr.bf16.mxu1 %v5213_v47  ;;  %v5304_v47 = vld [vmem:[%s6073_s14 + $0x1c0] ss:$24 sps:$4 sm:$0xff]  }
  0x62   : > { %1173 = vmatpush1.bf16.msra.mxu0 %v5215_v48  ;;  %v5307_v48 = vld [vmem:[%s6078_s16 + $0x1b0] ss:$24 sps:$4 sm:$0xff]  }
  0x63   : > { %1216 = vmatpush1.bf16.msra.mxu1 %v5216_v49  ;;  %1174 = vmatprep.subr.bf16.mxu0 %v5217_v50  ;;  %v5312_v49 = vld [vmem:[%s6073_s14 + $0x1f4] ss:$24 sps:$4 sm:$0xff]   ;;  %v5315_v50 = vld [vmem:[%s6078_s16 + $0x1e4] ss:$24 sps:$4 sm:$0xff]  }
  0x64   : > { %1217 = vmatprep.subr.bf16.mxu1 %v5219_v51  ;;  %v5310_v51 = vld [vmem:[%s6073_s14 + $0x1f0] ss:$24 sps:$4 sm:$0xff]  }
  0x66   : > { %1175 = vmatpush1.bf16.msra.mxu0 %v5221_v52  ;;  %v5313_v52 = vld [vmem:[%s6078_s16 + $0x1e0] ss:$24 sps:$4 sm:$0xff]  }
  0x67   : > { %1218 = vmatpush1.bf16.msra.mxu1 %v5222_v53  ;;  %1176 = vmatprep.subr.bf16.mxu0 %v5223_v55  ;;  %v5318_v53 = vld [vmem:[%s6073_s14 + $0x224] ss:$24 sps:$4 sm:$0xff]   ;;  %v5316_v55 = vld [vmem:[%s6073_s14 + $0x220] ss:$24 sps:$4 sm:$0xff]  }
  0x68   : > { %1219 = vmatprep.subr.bf16.mxu1 %v5225_v56  ;;  %v5319_v56 = vld [vmem:[%s6078_s16 + $0x210] ss:$24 sps:$4 sm:$0xff]  }
  0x6a   : > { %1177 = vmatpush1.bf16.msra.mxu0 %v5227_v57  ;;  %v5324_v57 = vld [vmem:[%s6073_s14 + $0x254] ss:$24 sps:$4 sm:$0xff]  }
  0x6b   : > { %1220 = vmatpush1.bf16.msra.mxu1 %v5228_v58  ;;  %1178 = vmatprep.subr.bf16.mxu0 %v5229_v59  ;;  %v5327_v58 = vld [vmem:[%s6078_s16 + $0x244] ss:$24 sps:$4 sm:$0xff]   ;;  %v5322_v59 = vld [vmem:[%s6073_s14 + $0x250] ss:$24 sps:$4 sm:$0xff]  }
  0x6c   : > { %1221 = vmatprep.subr.bf16.mxu1 %v5231_v60  ;;  %v5325_v60 = vld [vmem:[%s6078_s16 + $0x240] ss:$24 sps:$4 sm:$0xff]  }
  0x6e   : > { %1179 = vmatpush1.bf16.msra.mxu0 %v5233_v61  ;;  %v5330_v61 = vld [vmem:[%s6073_s14 + $0x284] ss:$24 sps:$4 sm:$0xff]  }
  0x6f   : > { %1222 = vmatpush1.bf16.msra.mxu1 %v5234_v62  ;;  %1180 = vmatprep.subr.bf16.mxu0 %v5235_v63  ;;  %v5333_v62 = vld [vmem:[%s6078_s16 + $0x274] ss:$24 sps:$4 sm:$0xff]   ;;  %v5328_v63 = vld [vmem:[%s6073_s14 + $0x280] ss:$24 sps:$4 sm:$0xff]  }
  0x70   : > { %1223 = vmatprep.subr.bf16.mxu1 %v5237_v0  ;;  %v5331_v0 = vld [vmem:[%s6078_s16 + $0x270] ss:$24 sps:$4 sm:$0xff]  }
  0x72   : > { %1181 = vmatpush1.bf16.msra.mxu0 %v5239_v1  ;;  %v5336_v1 = vld [vmem:[%s6073_s14 + $0x2b4] ss:$24 sps:$4 sm:$0xff]  }
  0x73   : > { %1224 = vmatpush1.bf16.msra.mxu1 %v5240_v2  ;;  %1182 = vmatprep.subr.bf16.mxu0 %v5241_v3  ;;  %v5339_v2 = vld [vmem:[%s6078_s16 + $0x2a4] ss:$24 sps:$4 sm:$0xff]   ;;  %v5334_v3 = vld [vmem:[%s6073_s14 + $0x2b0] ss:$24 sps:$4 sm:$0xff]  }
  0x74   : > { %1225 = vmatprep.subr.bf16.mxu1 %v5243_v4  ;;  %v5337_v4 = vld [vmem:[%s6078_s16 + $0x2a0] ss:$24 sps:$4 sm:$0xff]  }
  0x76   : > { %1183 = vmatpush1.bf16.msra.mxu0 %v5245_v5  ;;  %v5342_v5 = vld [vmem:[%s6073_s14 + $0x2e4] ss:$24 sps:$4 sm:$0xff]  }
  0x77   : > { %1226 = vmatpush1.bf16.msra.mxu1 %v5246_v6  ;;  %1238 = vmatprep.subr.bf16.mxu0 %v5252_v7  ;;  %v5345_v6 = vld [vmem:[%s6078_s16 + $0x2d4] ss:$24 sps:$4 sm:$0xff]   ;;  %v5340_v7 = vld [vmem:[%s6073_s14 + $0x2e0] ss:$24 sps:$4 sm:$0xff]  }
  0x78   : > { %1905 = vmatprep.subr.bf16.mxu1 %v5255_v8  ;;  %v5343_v8 = vld [vmem:[%s6078_s16 + $0x2d0] ss:$24 sps:$4 sm:$0xff]  }
  0x79   : > { %1185 = vmatmul.mubr.bf16.vlgmr.msra.gmra.mrb[0].mxu0 %v6153_v9 }
  0x7a   : > { %1228 = vmatmul.mubr.bf16.vlgmr.msra.gmra.mrb[0].mxu1 %v6153_v9  ;;  %1239 = vmatpush1.bf16.msra.mxu0 %v5250_v10  ;;  %v5351_v10 = vld [vmem:[%s6078_s16 + $0xc] ss:$24 sps:$4 sm:$0xff]  }
  0x7b   : > { %1906 = vmatpush1.bf16.msra.mxu1 %v5253_v11  ;;  %1240 = vmatprep.subr.bf16.mxu0 %v5258_v12  ;;  %v5354_v11 = vld [vmem:[%s6078_s16 + $0x14] ss:$24 sps:$4 sm:$0xff]  }
  0x7c   : > { %1907 = vmatprep.subr.bf16.mxu1 %v5261_v13  ;;  %1270 = vmatprep.mubr.bf16.mxu0 %v5247_v54  ;;  %v5321_v54 = vld [vmem:[%s6078_s16 + $0x214] ss:$24 sps:$4 sm:$0xff]   ;;  %v5349_v13 = vld [vmem:[%s6078_s16 + $0x8] ss:$24 sps:$4 sm:$0xff]  }
  0x7d   : > { %1937 = vmatprep.mubr.bf16.mxu1 %v6185_v36  ;;  %v6228_v12 = vld [vmem:[%s460_s19] ss:$8 sps:$4 sm:$0xff]  }
  0x7e   : > { %1241 = vmatpush1.bf16.msra.mxu0 %v5256_v14  ;;  %v5352_v14 = vld [vmem:[%s6078_s16 + $0x10] ss:$24 sps:$4 sm:$0xff]  }
  0x7f   : > { %1908 = vmatpush1.bf16.msra.mxu1 %v5259_v15  ;;  %1242 = vmatprep.subr.bf16.mxu0 %v5264_v16  ;;  %v5357_v15 = vld [vmem:[%s6078_s16 + $0x3c] ss:$24 sps:$4 sm:$0xff]  }
  0x80   : > { %1909 = vmatprep.subr.bf16.mxu1 %v5267_v17  ;;  %v5360_v16 = vld [vmem:[%s6078_s16 + $0x44] ss:$24 sps:$4 sm:$0xff]   ;;  %v5355_v17 = vld [vmem:[%s6078_s16 + $0x38] ss:$24 sps:$4 sm:$0xff]  }
  0x82   : > { %1243 = vmatpush1.bf16.msra.mxu0 %v5262_v18  ;;  %v5358_v18 = vld [vmem:[%s6078_s16 + $0x40] ss:$24 sps:$4 sm:$0xff]  }
  0x83   : > { %1910 = vmatpush1.bf16.msra.mxu1 %v5265_v19  ;;  %1244 = vmatprep.subr.bf16.mxu0 %v5270_v20  ;;  %v5363_v19 = vld [vmem:[%s6078_s16 + $0x6c] ss:$24 sps:$4 sm:$0xff]  }
  0x84   : > { %1911 = vmatprep.subr.bf16.mxu1 %v5273_v21  ;;  %v5366_v20 = vld [vmem:[%s6078_s16 + $0x74] ss:$24 sps:$4 sm:$0xff]   ;;  %v5364_v21 = vld [vmem:[%s6078_s16 + $0x70] ss:$24 sps:$4 sm:$0xff]  }
  0x86   : > { %1245 = vmatpush1.bf16.msra.mxu0 %v5268_v22  ;;  %v5369_v22 = vld [vmem:[%s6078_s16 + $0x9c] ss:$24 sps:$4 sm:$0xff]  }
  0x87   : > { %1912 = vmatpush1.bf16.msra.mxu1 %v5271_v23  ;;  %1246 = vmatprep.subr.bf16.mxu0 %v5276_v24  ;;  %v5372_v23 = vld [vmem:[%s6078_s16 + $0xa4] ss:$24 sps:$4 sm:$0xff]   ;;  %v5367_v24 = vld [vmem:[%s6078_s16 + $0x98] ss:$24 sps:$4 sm:$0xff]  }
  0x88   : > { %1913 = vmatprep.subr.bf16.mxu1 %v5279_v25  ;;  %v5370_v25 = vld [vmem:[%s6078_s16 + $0xa0] ss:$24 sps:$4 sm:$0xff]  }
  0x8a   : > { %1247 = vmatpush1.bf16.msra.mxu0 %v5274_v26  ;;  %v5375_v26 = vld [vmem:[%s6078_s16 + $0xcc] ss:$24 sps:$4 sm:$0xff]  }
  0x8b   : > { %1914 = vmatpush1.bf16.msra.mxu1 %v5277_v27  ;;  %1248 = vmatprep.subr.bf16.mxu0 %v5282_v28  ;;  %v5378_v27 = vld [vmem:[%s6078_s16 + $0xd4] ss:$24 sps:$4 sm:$0xff]   ;;  %v5373_v28 = vld [vmem:[%s6078_s16 + $0xc8] ss:$24 sps:$4 sm:$0xff]  }
  0x8c   : > { %1915 = vmatprep.subr.bf16.mxu1 %v5285_v29  ;;  %v5376_v29 = vld [vmem:[%s6078_s16 + $0xd0] ss:$24 sps:$4 sm:$0xff]  }
  0x8e   : > { %1249 = vmatpush1.bf16.msra.mxu0 %v5280_v30  ;;  %v5381_v30 = vld [vmem:[%s6078_s16 + $0xfc] ss:$24 sps:$4 sm:$0xff]  }
  0x8f   : > { %1916 = vmatpush1.bf16.msra.mxu1 %v5283_v31  ;;  %1250 = vmatprep.subr.bf16.mxu0 %v5288_v32  ;;  %v5384_v31 = vld [vmem:[%s6078_s16 + $0x104] ss:$24 sps:$4 sm:$0xff]   ;;  %v5379_v32 = vld [vmem:[%s6078_s16 + $0xf8] ss:$24 sps:$4 sm:$0xff]  }
  0x90   : > { %1917 = vmatprep.subr.bf16.mxu1 %v5291_v33  ;;  %v5382_v33 = vld [vmem:[%s6078_s16 + $0x100] ss:$24 sps:$4 sm:$0xff]  }
  0x92   : > { %1251 = vmatpush1.bf16.msra.mxu0 %v5286_v34  ;;  %v5387_v34 = vld [vmem:[%s6078_s16 + $0x12c] ss:$24 sps:$4 sm:$0xff]  }
  0x93   : > { %1918 = vmatpush1.bf16.msra.mxu1 %v5289_v35  ;;  %1252 = vmatprep.subr.bf16.mxu0 %v5294_v37  ;;  %v5390_v35 = vld [vmem:[%s6078_s16 + $0x134] ss:$24 sps:$4 sm:$0xff]   ;;  %v5388_v37 = vld [vmem:[%s6078_s16 + $0x130] ss:$24 sps:$4 sm:$0xff]  }
  0x94   : > { %1919 = vmatprep.subr.bf16.mxu1 %v5297_v38  ;;  %v5393_v38 = vld [vmem:[%s6078_s16 + $0x15c] ss:$24 sps:$4 sm:$0xff]  }
  0x96   : > { %1253 = vmatpush1.bf16.msra.mxu0 %v5292_v39  ;;  %v5396_v39 = vld [vmem:[%s6078_s16 + $0x164] ss:$24 sps:$4 sm:$0xff]  }
  0x97   : > { %1920 = vmatpush1.bf16.msra.mxu1 %v5295_v40  ;;  %1254 = vmatprep.subr.bf16.mxu0 %v5300_v41  ;;  %v5391_v40 = vld [vmem:[%s6078_s16 + $0x158] ss:$24 sps:$4 sm:$0xff]  }
  0x98   : > { %1921 = vmatprep.subr.bf16.mxu1 %v5303_v42  ;;  %v5394_v41 = vld [vmem:[%s6078_s16 + $0x160] ss:$24 sps:$4 sm:$0xff]   ;;  %v5399_v42 = vld [vmem:[%s6078_s16 + $0x18c] ss:$24 sps:$4 sm:$0xff]  }
  0x9a   : > { %1255 = vmatpush1.bf16.msra.mxu0 %v5298_v43  ;;  %v5402_v43 = vld [vmem:[%s6078_s16 + $0x194] ss:$24 sps:$4 sm:$0xff]  }
  0x9b   : > { %1922 = vmatpush1.bf16.msra.mxu1 %v5301_v44  ;;  %1256 = vmatprep.subr.bf16.mxu0 %v5306_v45  ;;  %v5397_v44 = vld [vmem:[%s6078_s16 + $0x188] ss:$24 sps:$4 sm:$0xff]  }
  0x9c   : > { %1923 = vmatprep.subr.bf16.mxu1 %v5309_v46  ;;  %v5400_v45 = vld [vmem:[%s6078_s16 + $0x190] ss:$24 sps:$4 sm:$0xff]   ;;  %v5405_v46 = vld [vmem:[%s6078_s16 + $0x1bc] ss:$24 sps:$4 sm:$0xff]  }
  0x9e   : > { %1257 = vmatpush1.bf16.msra.mxu0 %v5304_v47  ;;  %v5408_v47 = vld [vmem:[%s6078_s16 + $0x1c4] ss:$24 sps:$4 sm:$0xff]  }
  0x9f   : > { %1924 = vmatpush1.bf16.msra.mxu1 %v5307_v48  ;;  %1258 = vmatprep.subr.bf16.mxu0 %v5312_v49  ;;  %v5403_v48 = vld [vmem:[%s6078_s16 + $0x1b8] ss:$24 sps:$4 sm:$0xff]  }
  0xa0   : > { %1925 = vmatprep.subr.bf16.mxu1 %v5315_v50  ;;  %v5406_v49 = vld [vmem:[%s6078_s16 + $0x1c0] ss:$24 sps:$4 sm:$0xff]   ;;  %v5411_v50 = vld [vmem:[%s6078_s16 + $0x1ec] ss:$24 sps:$4 sm:$0xff]  }
  0xa2   : > { %1259 = vmatpush1.bf16.msra.mxu0 %v5310_v51  ;;  %v5414_v51 = vld [vmem:[%s6078_s16 + $0x1f4] ss:$24 sps:$4 sm:$0xff]  }
  0xa3   : > { %1926 = vmatpush1.bf16.msra.mxu1 %v5313_v52  ;;  %1260 = vmatprep.subr.bf16.mxu0 %v5318_v53  ;;  %v5409_v52 = vld [vmem:[%s6078_s16 + $0x1e8] ss:$24 sps:$4 sm:$0xff]  }
  0xa4   : > { %1927 = vmatprep.subr.bf16.mxu1 %v5321_v54  ;;  %v5412_v53 = vld [vmem:[%s6078_s16 + $0x1f0] ss:$24 sps:$4 sm:$0xff]   ;;  %v5417_v54 = vld [vmem:[%s6078_s16 + $0x21c] ss:$24 sps:$4 sm:$0xff]  }
  0xa6   : > { %1261 = vmatpush1.bf16.msra.mxu0 %v5316_v55  ;;  %v5420_v55 = vld [vmem:[%s6078_s16 + $0x224] ss:$24 sps:$4 sm:$0xff]  }
  0xa7   : > { %1928 = vmatpush1.bf16.msra.mxu1 %v5319_v56  ;;  %1262 = vmatprep.subr.bf16.mxu0 %v5324_v57  ;;  %v5415_v56 = vld [vmem:[%s6078_s16 + $0x218] ss:$24 sps:$4 sm:$0xff]  }
  0xa8   : > { %1929 = vmatprep.subr.bf16.mxu1 %v5327_v58  ;;  %v5418_v57 = vld [vmem:[%s6078_s16 + $0x220] ss:$24 sps:$4 sm:$0xff]   ;;  %v5423_v58 = vld [vmem:[%s6078_s16 + $0x24c] ss:$24 sps:$4 sm:$0xff]  }
  0xaa   : > { %1263 = vmatpush1.bf16.msra.mxu0 %v5322_v59  ;;  %v5426_v59 = vld [vmem:[%s6078_s16 + $0x254] ss:$24 sps:$4 sm:$0xff]  }
  0xab   : > { %1930 = vmatpush1.bf16.msra.mxu1 %v5325_v60  ;;  %1264 = vmatprep.subr.bf16.mxu0 %v5330_v61  ;;  %v5421_v60 = vld [vmem:[%s6078_s16 + $0x248] ss:$24 sps:$4 sm:$0xff]  }
  0xac   : > { %1931 = vmatprep.subr.bf16.mxu1 %v5333_v62  ;;  %v5424_v61 = vld [vmem:[%s6078_s16 + $0x250] ss:$24 sps:$4 sm:$0xff]   ;;  %v5429_v62 = vld [vmem:[%s6078_s16 + $0x27c] ss:$24 sps:$4 sm:$0xff]  }
  0xae   : > { %1265 = vmatpush1.bf16.msra.mxu0 %v5328_v63  ;;  %v5432_v63 = vld [vmem:[%s6078_s16 + $0x284] ss:$24 sps:$4 sm:$0xff]  }
  0xaf   : > { %1932 = vmatpush1.bf16.msra.mxu1 %v5331_v0  ;;  %1266 = vmatprep.subr.bf16.mxu0 %v5336_v1  ;;  %v5427_v0 = vld [vmem:[%s6078_s16 + $0x278] ss:$24 sps:$4 sm:$0xff]  }
  0xb0   : > { %1933 = vmatprep.subr.bf16.mxu1 %v5339_v2  ;;  %v5430_v1 = vld [vmem:[%s6078_s16 + $0x280] ss:$24 sps:$4 sm:$0xff]   ;;  %v5435_v2 = vld [vmem:[%s6078_s16 + $0x2ac] ss:$24 sps:$4 sm:$0xff]  }
  0xb2   : > { %1267 = vmatpush1.bf16.msra.mxu0 %v5334_v3  ;;  %v5438_v3 = vld [vmem:[%s6078_s16 + $0x2b4] ss:$24 sps:$4 sm:$0xff]  }
  0xb3   : > { %1934 = vmatpush1.bf16.msra.mxu1 %v5337_v4  ;;  %1268 = vmatprep.subr.bf16.mxu0 %v5342_v5  ;;  %v5433_v4 = vld [vmem:[%s6078_s16 + $0x2a8] ss:$24 sps:$4 sm:$0xff]  }
  0xb4   : > { %1935 = vmatprep.subr.bf16.mxu1 %v5345_v6  ;;  %v5436_v5 = vld [vmem:[%s6078_s16 + $0x2b0] ss:$24 sps:$4 sm:$0xff]   ;;  %v5441_v6 = vld [vmem:[%s6078_s16 + $0x2dc] ss:$24 sps:$4 sm:$0xff]  }
  0xb6   : > { %1269 = vmatpush1.bf16.msra.mxu0 %v5340_v7  ;;  %v5444_v7 = vld [vmem:[%s6078_s16 + $0x2e4] ss:$24 sps:$4 sm:$0xff]  }
  0xb7   : > { %1936 = vmatpush1.bf16.msra.mxu1 %v5343_v8  ;;  %1948 = vmatprep.subr.bf16.mxu0 %v5351_v10  ;;  %v5439_v8 = vld [vmem:[%s6078_s16 + $0x2d8] ss:$24 sps:$4 sm:$0xff]  }
  0xb8   : > { %1991 = vmatprep.subr.bf16.mxu1 %v5354_v11  ;;  %v5442_v10 = vld [vmem:[%s6078_s16 + $0x2e0] ss:$24 sps:$4 sm:$0xff]  }
  0xb9   : > { %1271 = vmatmul.mubr.bf16.vlgmr.msra.gmra.mrb[4].mxu0 %v6153_v9  ;;  %v5361_v9 = vld [vmem:[%s6078_s16 + $0x68] ss:$24 sps:$4 sm:$0xff]  }
  0xba   : > { %1938 = vmatmul.mubr.bf16.vlgmr.msra.gmra.mrb[4].mxu1 %v6228_v12  ;;  %1949 = vmatpush1.bf16.msra.mxu0 %v5349_v13  ;;  %v552_v11 = vld [vmem:[#allocation2] sm:$0xff]  ;;  %v554_v13 = vld [vmem:[#allocation2 + $0x10] sm:$0xff] }
  0xbb   : > { %1992 = vmatpush1.bf16.msra.mxu1 %v5352_v14  ;;  %1950 = vmatprep.subr.bf16.mxu0 %v5357_v15  ;;  %v553_v14 = vld [vmem:[#allocation2 + $0x8] sm:$0xff]  ;;  %v555_v15 = vld [vmem:[#allocation2 + $0x18] sm:$0xff] }
  0xbc   : > { %1993 = vmatprep.subr.bf16.mxu1 %v5360_v16  ;;  %1980 = vmatprep.mubr.bf16.mxu0 %v6185_v36 }
  0xbd   : > { %2023 = vmatprep.mubr.bf16.mxu1 %v6185_v36  ;;  %v5385_v36 = vld [vmem:[%s6078_s16 + $0x128] ss:$24 sps:$4 sm:$0xff]  }
  0xbe   : > { %1951 = vmatpush1.bf16.msra.mxu0 %v5355_v17 }
  0xbf   : > { %1994 = vmatpush1.bf16.msra.mxu1 %v5358_v18  ;;  %1952 = vmatprep.subr.bf16.mxu0 %v5363_v19  ;;  %v558_v18 = vld [vmem:[#allocation2 + $0x30] sm:$0xff]  ;;  %v560_v19 = vld [vmem:[#allocation2 + $0x40] sm:$0xff] }
  0xc0   : > { %1995 = vmatprep.subr.bf16.mxu1 %v5366_v20 }
  0xc2   : > { %1953 = vmatpush1.bf16.msra.mxu0 %v5361_v9 }
  0xc3   : > { %1996 = vmatpush1.bf16.msra.mxu1 %v5364_v21  ;;  %1954 = vmatprep.subr.bf16.mxu0 %v5369_v22 }
  0xc4   : > { %1997 = vmatprep.subr.bf16.mxu1 %v5372_v23  ;;  %v559_v23 = vld [vmem:[#allocation2 + $0x38] sm:$0xff] }
  0xc6   : > { %1955 = vmatpush1.bf16.msra.mxu0 %v5367_v24  ;;  %v561_v24 = vld [vmem:[#allocation2 + $0x48] sm:$0xff] }
  0xc7   : > { %1998 = vmatpush1.bf16.msra.mxu1 %v5370_v25  ;;  %1956 = vmatprep.subr.bf16.mxu0 %v5375_v26 }
  0xc8   : > { %1999 = vmatprep.subr.bf16.mxu1 %v5378_v27 }
  0xca   : > { %1957 = vmatpush1.bf16.msra.mxu0 %v5373_v28 }
  0xcb   : > { %2000 = vmatpush1.bf16.msra.mxu1 %v5376_v29  ;;  %1958 = vmatprep.subr.bf16.mxu0 %v5381_v30 }
  0xcc   : > { %2001 = vmatprep.subr.bf16.mxu1 %v5384_v31 }
  0xce   : > { %1959 = vmatpush1.bf16.msra.mxu0 %v5379_v32 }
  0xcf   : > { %2002 = vmatpush1.bf16.msra.mxu1 %v5382_v33  ;;  %1960 = vmatprep.subr.bf16.mxu0 %v5387_v34  ;;  %v556_v34 = vld [vmem:[#allocation2 + $0x20] sm:$0xff] }
  0xd0   : > { %2003 = vmatprep.subr.bf16.mxu1 %v5390_v35  ;;  %v1305_v35 = vld [vmem:[#allocation3] sm:$0xff] }
  0xd2   : > { %1961 = vmatpush1.bf16.msra.mxu0 %v5385_v36  ;;  %v557_v36 = vld [vmem:[#allocation2 + $0x28] sm:$0xff] }
  0xd3   : > { %2004 = vmatpush1.bf16.msra.mxu1 %v5388_v37  ;;  %1962 = vmatprep.subr.bf16.mxu0 %v5393_v38  ;;  %v1306_v37 = vld [vmem:[#allocation3 + $0x8] sm:$0xff] }
  0xd4   : > { %2005 = vmatprep.subr.bf16.mxu1 %v5396_v39 }
  0xd6   : > { %1963 = vmatpush1.bf16.msra.mxu0 %v5391_v40  ;;  %v562_v40 = vld [vmem:[#allocation2 + $0x50] sm:$0xff] }
  0xd7   : > { %2006 = vmatpush1.bf16.msra.mxu1 %v5394_v41  ;;  %1964 = vmatprep.subr.bf16.mxu0 %v5399_v42  ;;  %v1311_v41 = vld [vmem:[#allocation3 + $0x30] sm:$0xff] }
  0xd8   : > { %2007 = vmatprep.subr.bf16.mxu1 %v5402_v43 }
  0xda   : > { %1965 = vmatpush1.bf16.msra.mxu0 %v5397_v44 }
  0xdb   : > { %2008 = vmatpush1.bf16.msra.mxu1 %v5400_v45  ;;  %1966 = vmatprep.subr.bf16.mxu0 %v5405_v46  ;;  %v563_v46 = vld [vmem:[#allocation2 + $0x58] sm:$0xff] }
  0xdc   : > { %2009 = vmatprep.subr.bf16.mxu1 %v5408_v47  ;;  %v1312_v47 = vld [vmem:[#allocation3 + $0x38] sm:$0xff] }
  0xde   : > { %1967 = vmatpush1.bf16.msra.mxu0 %v5403_v48 }
  0xdf   : > { %2010 = vmatpush1.bf16.msra.mxu1 %v5406_v49  ;;  %1968 = vmatprep.subr.bf16.mxu0 %v5411_v50 }
  0xe0   : > { %2011 = vmatprep.subr.bf16.mxu1 %v5414_v51 }
  0xe2   : > { %1969 = vmatpush1.bf16.msra.mxu0 %v5409_v52 }
  0xe3   : > { %2012 = vmatpush1.bf16.msra.mxu1 %v5412_v53  ;;  %1970 = vmatprep.subr.bf16.mxu0 %v5417_v54 }
  0xe4   : > { %2013 = vmatprep.subr.bf16.mxu1 %v5420_v55 }
  0xe6   : > { %1971 = vmatpush1.bf16.msra.mxu0 %v5415_v56 }
  0xe7   : > { %2014 = vmatpush1.bf16.msra.mxu1 %v5418_v57  ;;  %1972 = vmatprep.subr.bf16.mxu0 %v5423_v58  ;;  %v1307_v58 = vld [vmem:[#allocation3 + $0x10] sm:$0xff] }
  0xe8   : > { %2015 = vmatprep.subr.bf16.mxu1 %v5426_v59  ;;  %v1309_v59 = vld [vmem:[#allocation3 + $0x20] sm:$0xff] }
  0xea   : > { %1973 = vmatpush1.bf16.msra.mxu0 %v5421_v60  ;;  %v1308_v60 = vld [vmem:[#allocation3 + $0x18] sm:$0xff] }
  0xeb   : > { %2016 = vmatpush1.bf16.msra.mxu1 %v5424_v61  ;;  %1974 = vmatprep.subr.bf16.mxu0 %v5429_v62  ;;  %v1310_v61 = vld [vmem:[#allocation3 + $0x28] sm:$0xff] }
  0xec   : > { %2017 = vmatprep.subr.bf16.mxu1 %v5432_v63 }
  0xee   : > { %1975 = vmatpush1.bf16.msra.mxu0 %v5427_v0  ;;  %v1313_v0 = vld [vmem:[#allocation3 + $0x40] sm:$0xff] }
  0xef   : > { %2018 = vmatpush1.bf16.msra.mxu1 %v5430_v1  ;;  %1976 = vmatprep.subr.bf16.mxu0 %v5435_v2  ;;  %v1315_v1 = vld [vmem:[#allocation3 + $0x50] sm:$0xff] }
  0xf0   : > { %2019 = vmatprep.subr.bf16.mxu1 %v5438_v3 }
  0xf2   : > { %1977 = vmatpush1.bf16.msra.mxu0 %v5433_v4 }
  0xf3   : > { %2020 = vmatpush1.bf16.msra.mxu1 %v5436_v5  ;;  %1978 = vmatprep.subr.bf16.mxu0 %v5441_v6  ;;  %v1314_v6 = vld [vmem:[#allocation3 + $0x48] sm:$0xff] }
  0xf4   : > { %2021 = vmatprep.subr.bf16.mxu1 %v5444_v7  ;;  %v1316_v7 = vld [vmem:[#allocation3 + $0x58] sm:$0xff] }
  0xf6   : > { %1979 = vmatpush1.bf16.msra.mxu0 %v5439_v8 }
  0xf7   : > { %2022 = vmatpush1.bf16.msra.mxu1 %v5442_v10 }
  0xf9   : > { %1981 = vmatmul.mubr.bf16.vlgmr.msra.gmra.mrb[8].mxu0 %v6228_v12 }
  0xfa   : > { %2024 = vmatmul.mubr.bf16.vlgmr.msra.gmra.mrb[8].mxu1 %v6228_v12 }
 0x14c   : > { %v1186_v16 = vpop.f32.mrb[0].mxu0 }
 0x14d   : > { %v1229_v17 = vpop.f32.mrb[0].mxu1  ;;  %v1281_v20 = vadd.f32 %v1186_v16, %v552_v11  ;;  %v1188_v21 = vpop.f32.mrb[1].mxu0 }
 0x14e   : > { %v1283_v9 = vadd.f32 %v1229_v17, %v554_v13  ;;  %v1231_v22 = vpop.f32.mrb[1].mxu1  ;;  %v1282_v25 = vadd.f32 %v1188_v21, %v553_v14  ;;  %v1190_v27 = vpop.f32.mrb[2].mxu0  ;;  %v5951_v21 = vmov (!%p4793_p10), 0  }
 0x14f   : > { %v1284_v26 = vadd.f32 %v1231_v22, %v555_v15  ;;  %v1233_v28 = vpop.f32.mrb[2].mxu1  ;;  %1293 = vst [vmem:[#allocation2] sm:$0xff] %v1281_v20  ;;  %v1287_v12 = vadd.f32 %v1190_v27, %v558_v18  ;;  %v1192_v30 = vpop.f32.mrb[3].mxu0  ;;  %v2062_v20 = vld [vmem:[%s7361_s0] sm:$0xff] (!%p4793_p10)  ;;  %5445 = vset.pattern.permute.xlu0 (!%p4793_p10), %v5951_v21 }
 0x150   : > { %1295 = vst [vmem:[#allocation2 + $0x10] sm:$0xff] %v1283_v9  ;;  %v1289_v29 = vadd.f32 %v1233_v28, %v560_v19  ;;  %v1235_v31 = vpop.f32.mrb[3].mxu1  ;;  %1294 = vst [vmem:[#allocation2 + $0x8] sm:$0xff] %v1282_v25  ;;  %v1288_v32 = vadd.f32 %v1192_v30, %v559_v23  ;;  %v2063_v9 = vld [vmem:[%s7361_s0 + $0x8] sm:$0xff] (!%p4793_p10)  ;;  %vm2064_vm0 = vcmp.eq.s32.totalorder (!%p4793_p10), %v2062_v20, 1 }
 0x151   : > { %1296 = vst [vmem:[#allocation2 + $0x18] sm:$0xff] %v1284_v26  ;;  %v1290_v33 = vadd.f32 %v1235_v31, %v561_v24  ;;  %1299 = vst [vmem:[#allocation2 + $0x30] sm:$0xff] %v1287_v12  ;;  %vm2065_vm1 = vcmp.eq.s32.totalorder (!%p4793_p10), %v2063_v9, 1  ;;  %v5446_v22 = vld [vmem:[%s7368_s7 + $0x4] ss:$24 sps:$4 sm:$0xff] (!%p4793_p10)   ;;  %v2202_v23 = vsel (!%p4793_p10), %vm2064_vm0, 1, %v5951_v21 }
 0x152   : > { %1301 = vst [vmem:[#allocation2 + $0x40] sm:$0xff] %v1289_v29  ;;  %1300 = vst [vmem:[#allocation2 + $0x38] sm:$0xff] %v1288_v32  ;;  %v5448_v24 = vld [vmem:[%s7368_s7 + $0x304] ss:$24 sps:$4 sm:$0xff] (!%p4793_p10)   ;;  %2205 = vperm.xlu0 (!%p4793_p10), %5445, %v2202_v23   ;;  %4035 = vmatprep.subr.bf16.mxu1 (!%p4793_p10), %v5446_v22  ;;  %v5450_v25 = vld [vmem:[%s7368_s7] ss:$24 sps:$4 sm:$0xff] (!%p4793_p10)  }
 0x153   : > { %1302 = vst [vmem:[#allocation2 + $0x48] sm:$0xff] %v1290_v33  ;;  %v5451_v26 = vld [vmem:[%s7368_s7 + $0x300] ss:$24 sps:$4 sm:$0xff] (!%p4793_p10)   ;;  %v2203_v27 = vsel (!%p4793_p10), %vm2065_vm1, 1, %v5951_v21  ;;  %4078 = vmatprep.subr.bf16.mxu0 (!%p4793_p10), %v5448_v24  ;;  %v5452_v28 = vld [vmem:[%s7368_s7 + $0x34] ss:$24 sps:$4 sm:$0xff] (!%p4793_p10)   ;;  %4036 = vmatpush1.bf16.msra.mxu1 (!%p4793_p10), %v5450_v25 }
 0x154   : > { %4079 = vmatpush1.bf16.msra.mxu0 (!%p4793_p10), %v5451_v26  ;;  %v5454_v12 = vld [vmem:[%s7368_s7 + $0x334] ss:$24 sps:$4 sm:$0xff] (!%p4793_p10)   ;;  %v5456_v29 = vld [vmem:[%s7368_s7 + $0x30] ss:$24 sps:$4 sm:$0xff] (!%p4793_p10)   ;;  %4037 = vmatprep.subr.bf16.mxu1 (!%p4793_p10), %v5452_v28  ;;  %v5458_v31 = vld [vmem:[%s7368_s7 + $0x64] ss:$24 sps:$4 sm:$0xff] (!%p4793_p10)   ;;  %v2080_v26 = vlaneseq (!%p4793_p10) }
 0x155   : > { %v5457_v30 = vld [vmem:[%s7368_s7 + $0x330] ss:$24 sps:$4 sm:$0xff] (!%p4793_p10)   ;;  %4080 = vmatprep.subr.bf16.mxu0 (!%p4793_p10), %v5454_v12  ;;  %v5460_v32 = vld [vmem:[%s7368_s7 + $0x364] ss:$24 sps:$4 sm:$0xff] (!%p4793_p10)   ;;  %v5462_v33 = vld [vmem:[%s7368_s7 + $0x60] ss:$24 sps:$4 sm:$0xff] (!%p4793_p10)  }
 0x156   : > { %2208 = vperm.xlu0 (!%p4793_p10), %5445, %v2203_v27   ;;  %v5535_v20 = vld [vmem:[%s7368_s7 + $0x5a0] ss:$24 sps:$4 sm:$0xff] (!%p4793_p10)   ;;  %v5536_v9 = vld [vmem:[%s7368_s7 + $0x2d4] ss:$24 sps:$4 sm:$0xff] (!%p4793_p10)   ;;  %v5540_v22 = vld [vmem:[%s7368_s7 + $0x2d0] ss:$24 sps:$4 sm:$0xff] (!%p4793_p10)  }
 0x157   : > { %4038 = vmatpush1.bf16.msra.mxu1 (!%p4793_p10), %v5456_v29  ;;  %v5538_v21 = vld [vmem:[%s7368_s7 + $0x5d4] ss:$24 sps:$4 sm:$0xff] (!%p4793_p10)   ;;  %v5541_v23 = vld [vmem:[%s7368_s7 + $0x5d0] ss:$24 sps:$4 sm:$0xff] (!%p4793_p10)   ;;  %v5544_v24 = vld [vmem:[%s7368_s7 + $0x604] ss:$24 sps:$4 sm:$0xff] (!%p4793_p10)  }
 0x158   : > { %4081 = vmatpush1.bf16.msra.mxu0 (!%p4793_p10), %v5457_v30  ;;  %4039 = vmatprep.subr.bf16.mxu1 (!%p4793_p10), %v5458_v31  ;;  %v5547_v25 = vld [vmem:[%s7368_s7 + $0xc] ss:$24 sps:$4 sm:$0xff] (!%p4793_p10)   ;;  %v2081_v27 = vshrl.u32 (!%p4793_p10), %v2080_v26, 7 }
 0x159   : > { %4082 = vmatprep.subr.bf16.mxu0 (!%p4793_p10), %v5460_v32  ;;  %v2078_v12 = vld [vmem:[%s7365_s4] sm:$0x3f] (!%p4793_p10)  ;;  %v2067_v32 = vld [vmem:[#allocation2 + $0x8] sm:$0xff] (!%p4793_p10) }
 0x15a   : > { %v6503_v28 = vsub.s32 (!%p4793_p10), 1, %v2081_v27  ;;  %v6511_v29 = vld [vmem:[%s7367_s6] sm:$0x3f] (!%p4793_p10)  ;;  %v6514_v31 = vsub.s32 (!%p4793_p10), 3, %v2081_v27 }
 0x15b   : > { %4040 = vmatpush1.bf16.msra.mxu1 (!%p4793_p10), %v5462_v33  ;;  %v2073_v33 = vld [vmem:[#allocation2 + $0x38] sm:$0xff] (!%p4793_p10) }
 0x15c   : > { %v2087_v30 = vrot.slane (!%p4793_p10), %v2078_v12, %v6503_v28 }
 0x18c   : > { %v1272_v38 = vpop.f32.mrb[4].mxu0 }
 0x18d   : > { %v1939_v39 = vpop.f32.mrb[4].mxu1  ;;  %v1285_v42 = vadd.f32 %v1272_v38, %v556_v34  ;;  %v1274_v44 = vpop.f32.mrb[5].mxu0  ;;  %v5463_v34 = vld [vmem:[%s7368_s7 + $0x360] ss:$24 sps:$4 sm:$0xff] (!%p4793_p10)   ;;  %v5469_v38 = vld [vmem:[%s7368_s7 + $0x390] ss:$24 sps:$4 sm:$0xff] (!%p4793_p10)  }
 0x18e   : > { %v2034_v43 = vadd.f32 %v1939_v39, %v1305_v35  ;;  %v1941_v45 = vpop.f32.mrb[5].mxu1  ;;  %v1286_v48 = vadd.f32 %v1274_v44, %v557_v36  ;;  %v1276_v50 = vpop.f32.mrb[6].mxu0  ;;  %v5464_v35 = vld [vmem:[%s7368_s7 + $0x94] ss:$24 sps:$4 sm:$0xff] (!%p4793_p10)   ;;  %4083 = vmatpush1.bf16.msra.mxu0 (!%p4793_p10), %v5463_v34  ;;  %v5470_v39 = vld [vmem:[%s7368_s7 + $0xc4] ss:$24 sps:$4 sm:$0xff] (!%p4793_p10)   ;;  %v2155_v34 = vrot.slane (!%p4793_p10), %v6511_v29, %v6503_v28 }
 0x18f   : > { %v2035_v49 = vadd.f32 %v1941_v45, %v1306_v37  ;;  %v1943_v51 = vpop.f32.mrb[6].mxu1  ;;  %1297 = vst [vmem:[#allocation2 + $0x20] sm:$0xff] %v1285_v42  ;;  %v1291_v52 = vadd.f32 %v1276_v50, %v562_v40  ;;  %v1278_v54 = vpop.f32.mrb[7].mxu0  ;;  %v5466_v36 = vld [vmem:[%s7368_s7 + $0x394] ss:$24 sps:$4 sm:$0xff] (!%p4793_p10)   ;;  %4041 = vmatprep.subr.bf16.mxu1 (!%p4793_p10), %v5464_v35 }
 0x190   : > { %2046 = vst [vmem:[#allocation3] sm:$0xff] %v2034_v43  ;;  %v2040_v53 = vadd.f32 %v1943_v51, %v1311_v41  ;;  %v1945_v55 = vpop.f32.mrb[7].mxu1  ;;  %1298 = vst [vmem:[#allocation2 + $0x28] sm:$0xff] %v1286_v48  ;;  %v1292_v56 = vadd.f32 %v1278_v54, %v563_v46  ;;  %v5468_v37 = vld [vmem:[%s7368_s7 + $0x90] ss:$24 sps:$4 sm:$0xff] (!%p4793_p10)   ;;  %4084 = vmatprep.subr.bf16.mxu0 (!%p4793_p10), %v5466_v36  ;;  %v2111_v36 = vadd.f32 (!%p4793_p10), %v2087_v30, %v2067_v32 }
 0x191   : > { %2047 = vst [vmem:[#allocation3 + $0x8] sm:$0xff] %v2035_v49  ;;  %v2041_v57 = vadd.f32 %v1945_v55, %v1312_v47  ;;  %1303 = vst [vmem:[#allocation2 + $0x50] sm:$0xff] %v1291_v52  ;;  %v5472_v40 = vld [vmem:[%s7368_s7 + $0x3c4] ss:$24 sps:$4 sm:$0xff] (!%p4793_p10)   ;;  %v5474_v41 = vld [vmem:[%s7368_s7 + $0xc0] ss:$24 sps:$4 sm:$0xff] (!%p4793_p10)   ;;  %4042 = vmatpush1.bf16.msra.mxu1 (!%p4793_p10), %v5468_v37 }
 0x192   : > { %2052 = vst [vmem:[#allocation3 + $0x30] sm:$0xff] %v2040_v53  ;;  %1304 = vst [vmem:[#allocation2 + $0x58] sm:$0xff] %v1292_v56  ;;  %4085 = vmatpush1.bf16.msra.mxu0 (!%p4793_p10), %v5469_v38  ;;  %v5475_v42 = vld [vmem:[%s7368_s7 + $0x3c0] ss:$24 sps:$4 sm:$0xff] (!%p4793_p10)   ;;  %4043 = vmatprep.subr.bf16.mxu1 (!%p4793_p10), %v5470_v39  ;;  %v5476_v43 = vld [vmem:[%s7368_s7 + $0xf4] ss:$24 sps:$4 sm:$0xff] (!%p4793_p10)   ;;  %v2095_v38 = vrot.slane (!%p4793_p10), %v2078_v12, %v6514_v31  ;;  %5878 = vtanh.f32 (!%p4793_p10), %v2111_v36 }
 0x193   : > { %2053 = vst [vmem:[#allocation3 + $0x38] sm:$0xff] %v2041_v57  ;;  %4086 = vmatprep.subr.bf16.mxu0 (!%p4793_p10), %v5472_v40  ;;  %v5478_v44 = vld [vmem:[%s7368_s7 + $0x3f4] ss:$24 sps:$4 sm:$0xff] (!%p4793_p10)   ;;  %v5480_v45 = vld [vmem:[%s7368_s7 + $0xf0] ss:$24 sps:$4 sm:$0xff] (!%p4793_p10)   ;;  %v6519_v39 = vsub.s32 (!%p4793_p10), 0, %v2081_v27  ;;  %v2117_v40 = vadd.f32 (!%p4793_p10), %v2087_v30, %v2073_v33 }
 0x194   : > { %v5481_v46 = vld [vmem:[%s7368_s7 + $0x3f0] ss:$24 sps:$4 sm:$0xff] (!%p4793_p10)   ;;  %v5482_v47 = vld [vmem:[%s7368_s7 + $0x124] ss:$24 sps:$4 sm:$0xff] (!%p4793_p10)   ;;  %v5486_v49 = vld [vmem:[%s7368_s7 + $0x120] ss:$24 sps:$4 sm:$0xff] (!%p4793_p10)  }
 0x195   : > { %4044 = vmatpush1.bf16.msra.mxu1 (!%p4793_p10), %v5474_v41  ;;  %v5484_v48 = vld [vmem:[%s7368_s7 + $0x424] ss:$24 sps:$4 sm:$0xff] (!%p4793_p10)   ;;  %v5487_v50 = vld [vmem:[%s7368_s7 + $0x420] ss:$24 sps:$4 sm:$0xff] (!%p4793_p10)   ;;  %v5488_v51 = vld [vmem:[%s7368_s7 + $0x154] ss:$24 sps:$4 sm:$0xff] (!%p4793_p10)   ;;  %5880 = vtanh.f32 (!%p4793_p10), %v2117_v40 }
 0x196   : > { %4087 = vmatpush1.bf16.msra.mxu0 (!%p4793_p10), %v5475_v42  ;;  %4045 = vmatprep.subr.bf16.mxu1 (!%p4793_p10), %v5476_v43  ;;  %v5490_v52 = vld [vmem:[%s7368_s7 + $0x454] ss:$24 sps:$4 sm:$0xff] (!%p4793_p10)   ;;  %v5492_v53 = vld [vmem:[%s7368_s7 + $0x150] ss:$24 sps:$4 sm:$0xff] (!%p4793_p10)   ;;  %v5494_v55 = vld [vmem:[%s7368_s7 + $0x184] ss:$24 sps:$4 sm:$0xff] (!%p4793_p10)  }
 0x197   : > { %4088 = vmatprep.subr.bf16.mxu0 (!%p4793_p10), %v5478_v44  ;;  %v5493_v54 = vld [vmem:[%s7368_s7 + $0x450] ss:$24 sps:$4 sm:$0xff] (!%p4793_p10)   ;;  %v5496_v56 = vld [vmem:[%s7368_s7 + $0x484] ss:$24 sps:$4 sm:$0xff] (!%p4793_p10)   ;;  %v5498_v57 = vld [vmem:[%s7368_s7 + $0x180] ss:$24 sps:$4 sm:$0xff] (!%p4793_p10)   ;;  %v2163_v44 = vrot.slane (!%p4793_p10), %v6511_v29, %v6514_v31 }
 0x198   : > { %v2135_v35 = vld [vmem:[#allocation3 + $0x8] sm:$0xff] (!%p4793_p10)  ;;  %v2069_v41 = vld [vmem:[#allocation2 + $0x18] sm:$0xff] (!%p4793_p10)  ;;  %v2076_v30 = vld [vmem:[#allocation2 + $0x50] sm:$0xff] (!%p4793_p10) }
 0x199   : > { %4046 = vmatpush1.bf16.msra.mxu1 (!%p4793_p10), %v5480_v45  ;;  %v2179_v42 = vadd.f32 (!%p4793_p10), %v2155_v34, %v2135_v35  ;;  %v2075_v43 = vld [vmem:[#allocation2 + $0x48] sm:$0xff] (!%p4793_p10) }
 0x19a   : > { %4089 = vmatpush1.bf16.msra.mxu0 (!%p4793_p10), %v5481_v46  ;;  %4047 = vmatprep.subr.bf16.mxu1 (!%p4793_p10), %v5482_v47  ;;  %v2141_v37 = vld [vmem:[#allocation3 + $0x38] sm:$0xff] (!%p4793_p10)  ;;  %v2113_v47 = vadd.f32 (!%p4793_p10), %v2095_v38, %v2069_v41 }
 0x19b   : > { %4090 = vmatprep.subr.bf16.mxu0 (!%p4793_p10), %v5484_v48  ;;  %v2185_v45 = vadd.f32 (!%p4793_p10), %v2155_v34, %v2141_v37  ;;  %5882 = vtanh.f32 (!%p4793_p10), %v2179_v42 }
 0x19d   : > { %4048 = vmatpush1.bf16.msra.mxu1 (!%p4793_p10), %v5486_v49  ;;  %v2083_v49 = vrot.slane (!%p4793_p10), %v2078_v12, %v6519_v39  ;;  %5884 = vtanh.f32 (!%p4793_p10), %v2185_v45 }
 0x19e   : > { %4091 = vmatpush1.bf16.msra.mxu0 (!%p4793_p10), %v5487_v50  ;;  %4049 = vmatprep.subr.bf16.mxu1 (!%p4793_p10), %v5488_v51  ;;  %v6524_v50 = vsub.s32 (!%p4793_p10), 2, %v2081_v27  ;;  %v2119_v51 = vadd.f32 (!%p4793_p10), %v2095_v38, %v2075_v43  ;;  %5886 = vtanh.f32 (!%p4793_p10), %v2113_v47 }
 0x19f   : > { %4092 = vmatprep.subr.bf16.mxu0 (!%p4793_p10), %v5490_v52  ;;  %v2066_v52 = vld [vmem:[#allocation2] sm:$0xff] (!%p4793_p10) }
 0x1a0   : > { %5888 = vtanh.f32 (!%p4793_p10), %v2119_v51 }
 0x1a1   : > { %4050 = vmatpush1.bf16.msra.mxu1 (!%p4793_p10), %v5492_v53 }
 0x1a2   : > { %4093 = vmatpush1.bf16.msra.mxu0 (!%p4793_p10), %v5493_v54  ;;  %4051 = vmatprep.subr.bf16.mxu1 (!%p4793_p10), %v5494_v55  ;;  %v2072_v54 = vld [vmem:[#allocation2 + $0x30] sm:$0xff] (!%p4793_p10)  ;;  %v2151_v55 = vrot.slane (!%p4793_p10), %v6511_v29, %v6519_v39 }
 0x1a3   : > { %4094 = vmatprep.subr.bf16.mxu0 (!%p4793_p10), %v5496_v56 }
 0x1a5   : > { %4052 = vmatpush1.bf16.msra.mxu1 (!%p4793_p10), %v5498_v57  ;;  %v2134_v57 = vld [vmem:[#allocation3] sm:$0xff] (!%p4793_p10) }
 0x1cc   : > { %v1982_v62 = vpop.f32.mrb[8].mxu0 }
 0x1cd   : > { %v2025_v63 = vpop.f32.mrb[8].mxu1  ;;  %v2036_v2 = vadd.f32 %v1982_v62, %v1307_v58  ;;  %v1984_v4 = vpop.f32.mrb[9].mxu0  ;;  %2061 = sbr.rel (%p4793_p10) target bundleno = 1133 (0x46d), region = 148  ;;  %v5499_v58 = vld [vmem:[%s7368_s7 + $0x480] ss:$24 sps:$4 sm:$0xff] (!%p4793_p10)  }
 0x1ce   : > { %v2038_v3 = vadd.f32 %v2025_v63, %v1309_v59  ;;  %v2027_v5 = vpop.f32.mrb[9].mxu1  ;;  %v2037_v8 = vadd.f32 %v1984_v4, %v1308_v60  ;;  %v1986_v11 = vpop.f32.mrb[10].mxu0  ;;  %v5500_v59 = vld [vmem:[%s7368_s7 + $0x1b4] ss:$24 sps:$4 sm:$0xff] (!%p4793_p10)   ;;  %4095 = vmatpush1.bf16.msra.mxu0 (!%p4793_p10), %v5499_v58  ;;  %v5505_v62 = vld [vmem:[%s7368_s7 + $0x4b0] ss:$24 sps:$4 sm:$0xff] (!%p4793_p10)   ;;  %v2110_v58 = vadd.f32 (!%p4793_p10), %v2083_v49, %v2066_v52 }
 0x1cf   : > { %v2039_v10 = vadd.f32 %v2027_v5, %v1310_v61  ;;  %v2029_v13 = vpop.f32.mrb[10].mxu1  ;;  %2048 = vst [vmem:[#allocation3 + $0x10] sm:$0xff] %v2036_v2  ;;  %v2042_v14 = vadd.f32 %v1986_v11, %v1313_v0  ;;  %v1988_v16 = vpop.f32.mrb[11].mxu0  ;;  %v5502_v60 = vld [vmem:[%s7368_s7 + $0x4b4] ss:$24 sps:$4 sm:$0xff] (!%p4793_p10)   ;;  %4053 = vmatprep.subr.bf16.mxu1 (!%p4793_p10), %v5500_v59 }
 0x1d0   : > { %2050 = vst [vmem:[#allocation3 + $0x20] sm:$0xff] %v2038_v3  ;;  %v2044_v15 = vadd.f32 %v2029_v13, %v1315_v1  ;;  %v2031_v17 = vpop.f32.mrb[11].mxu1  ;;  %2049 = vst [vmem:[#allocation3 + $0x18] sm:$0xff] %v2037_v8  ;;  %v2043_v18 = vadd.f32 %v1988_v16, %v1314_v6  ;;  %v5504_v61 = vld [vmem:[%s7368_s7 + $0x1b0] ss:$24 sps:$4 sm:$0xff] (!%p4793_p10)   ;;  %4096 = vmatprep.subr.bf16.mxu0 (!%p4793_p10), %v5502_v60  ;;  %v2091_v60 = vrot.slane (!%p4793_p10), %v2078_v12, %v6524_v50 }
 0x1d1   : > { %2051 = vst [vmem:[#allocation3 + $0x28] sm:$0xff] %v2039_v10  ;;  %v2045_v19 = vadd.f32 %v2031_v17, %v1316_v7  ;;  %2054 = vst [vmem:[#allocation3 + $0x40] sm:$0xff] %v2042_v14  ;;  %v5506_v63 = vld [vmem:[%s7368_s7 + $0x1e4] ss:$24 sps:$4 sm:$0xff] (!%p4793_p10)   ;;  %v5510_v1 = vld [vmem:[%s7368_s7 + $0x1e0] ss:$24 sps:$4 sm:$0xff] (!%p4793_p10)   ;;  %4054 = vmatpush1.bf16.msra.mxu1 (!%p4793_p10), %v5504_v61 }
 0x1d2   : > { %2056 = vst [vmem:[#allocation3 + $0x50] sm:$0xff] %v2044_v15  ;;  %2055 = vst [vmem:[#allocation3 + $0x48] sm:$0xff] %v2043_v18  ;;  %v5508_v0 = vld [vmem:[%s7368_s7 + $0x4e4] ss:$24 sps:$4 sm:$0xff] (!%p4793_p10)   ;;  %4097 = vmatpush1.bf16.msra.mxu0 (!%p4793_p10), %v5505_v62  ;;  %v5511_v2 = vld [vmem:[%s7368_s7 + $0x4e0] ss:$24 sps:$4 sm:$0xff] (!%p4793_p10)   ;;  %4055 = vmatprep.subr.bf16.mxu1 (!%p4793_p10), %v5506_v63  ;;  %v2116_v62 = vadd.f32 (!%p4793_p10), %v2083_v49, %v2072_v54 }
 0x1d3   : > { %2057 = vst [vmem:[#allocation3 + $0x58] sm:$0xff] %v2045_v19  ;;  %4098 = vmatprep.subr.bf16.mxu0 (!%p4793_p10), %v5508_v0  ;;  %v5512_v3 = vld [vmem:[%s7368_s7 + $0x214] ss:$24 sps:$4 sm:$0xff] (!%p4793_p10)   ;;  %v5516_v5 = vld [vmem:[%s7368_s7 + $0x210] ss:$24 sps:$4 sm:$0xff] (!%p4793_p10)   ;;  %v6529_v61 = vsub.s32 (!%p4793_p10), 4, %v2081_v27  ;;  %v2178_v0 = vadd.f32 (!%p4793_p10), %v2151_v55, %v2134_v57 }
 0x1d4   : > { %v5514_v4 = vld [vmem:[%s7368_s7 + $0x514] ss:$24 sps:$4 sm:$0xff]   ;;  %v5517_v6 = vld [vmem:[%s7368_s7 + $0x510] ss:$24 sps:$4 sm:$0xff]   ;;  %v5518_v7 = vld [vmem:[%s7368_s7 + $0x244] ss:$24 sps:$4 sm:$0xff]  }
 0x1d5   : > { %4056 = vmatpush1.bf16.msra.mxu1 %v5510_v1  ;;  %v5520_v8 = vld [vmem:[%s7368_s7 + $0x544] ss:$24 sps:$4 sm:$0xff]   ;;  %v5522_v10 = vld [vmem:[%s7368_s7 + $0x240] ss:$24 sps:$4 sm:$0xff]   ;;  %v5524_v13 = vld [vmem:[%s7368_s7 + $0x274] ss:$24 sps:$4 sm:$0xff]  }
 0x1d6   : > { %4099 = vmatpush1.bf16.msra.mxu0 %v5511_v2  ;;  %4057 = vmatprep.subr.bf16.mxu1 %v5512_v3  ;;  %v5523_v11 = vld [vmem:[%s7368_s7 + $0x540] ss:$24 sps:$4 sm:$0xff]   ;;  %v5526_v14 = vld [vmem:[%s7368_s7 + $0x574] ss:$24 sps:$4 sm:$0xff]   ;;  %v5528_v15 = vld [vmem:[%s7368_s7 + $0x270] ss:$24 sps:$4 sm:$0xff]   ;;  %v2159_v2 = vrot.slane %v6511_v29, %v6524_v50 }
 0x1d7   : > { %4100 = vmatprep.subr.bf16.mxu0 %v5514_v4  ;;  %v5529_v16 = vld [vmem:[%s7368_s7 + $0x570] ss:$24 sps:$4 sm:$0xff]   ;;  %v5530_v17 = vld [vmem:[%s7368_s7 + $0x2a4] ss:$24 sps:$4 sm:$0xff]   ;;  %v5534_v19 = vld [vmem:[%s7368_s7 + $0x2a0] ss:$24 sps:$4 sm:$0xff]  }
 0x1d8   : > { %v5532_v18 = vld [vmem:[%s7368_s7 + $0x5a4] ss:$24 sps:$4 sm:$0xff]   ;;  %v2140_v59 = vld [vmem:[#allocation3 + $0x30] sm:$0xff]  ;;  %v6533_v3 = vsub.s32 5, %v2081_v27  ;;  %v2139_v36 = vld [vmem:[#allocation3 + $0x28] sm:$0xff] }
 0x1d9   : > { %4058 = vmatpush1.bf16.msra.mxu1 %v5516_v5  ;;  %v2137_v46 = vld [vmem:[#allocation3 + $0x18] sm:$0xff]  ;;  %v2143_v48 = vld [vmem:[#allocation3 + $0x48] sm:$0xff]  ;;  %v2068_v63 = vld [vmem:[#allocation2 + $0x10] sm:$0xff]  ;;  %v2184_v4 = vadd.f32 %v2151_v55, %v2140_v59 }
 0x1da   : > { %4101 = vmatpush1.bf16.msra.mxu0 %v5517_v6  ;;  %4059 = vmatprep.subr.bf16.mxu1 %v5518_v7  ;;  %v2181_v53 = vadd.f32 %v2163_v44, %v2137_v46  ;;  %v2187_v56 = vadd.f32 %v2163_v44, %v2143_v48  ;;  %v2074_v1 = vld [vmem:[#allocation2 + $0x40] sm:$0xff]  ;;  %v2136_v5 = vld [vmem:[#allocation3 + $0x10] sm:$0xff]  ;;  %v2112_v6 = vadd.f32 %v2091_v60, %v2068_v63 }
 0x1db   : > { %4102 = vmatprep.subr.bf16.mxu0 %v5520_v8  ;;  %v2142_v7 = vld [vmem:[#allocation3 + $0x40] sm:$0xff]  ;;  %v2099_v8 = vrot.slane %v2078_v12, %v6529_v61  ;;  %v2144_v34 = vld [vmem:[#allocation3 + $0x50] sm:$0xff] }
 0x1dc   : > { %5890 = vtanh.f32 %v2181_v53  ;;  %v6543_v53 = vpop.permute.xlu0 %2205 }
 0x1dd   : > { %4060 = vmatpush1.bf16.msra.mxu1 %v5522_v10  ;;  %5892 = vtanh.f32 %v2187_v56  ;;  %v2118_v10 = vadd.f32 %v2091_v60, %v2074_v1  ;;  %v2120_v40 = vadd.f32 %v2099_v8, %v2076_v30  ;;  %vm2210_vm2 = vcmp.eq.s32.totalorder %v6543_v53, 1  ;;  %v5565_v30 = vld [vmem:[%s7368_s7 + $0x9c] ss:$24 sps:$4 sm:$0xff]  }
 0x1de   : > { %4103 = vmatpush1.bf16.msra.mxu0 %v5523_v11  ;;  %4061 = vmatprep.subr.bf16.mxu1 %v5524_v13  ;;  %5894 = vtanh.f32 %v2110_v58  ;;  %v2070_v11 = vld [vmem:[#allocation2 + $0x20] sm:$0xff]  ;;  %v2167_v13 = vrot.slane %v6511_v29, %v6529_v61 }
 0x1df   : > { %4104 = vmatprep.subr.bf16.mxu0 %v5526_v14  ;;  %5896 = vtanh.f32 %v2116_v62  ;;  %v5879_v14 = vpop.eup %5878 }
 0x1e0   : > { %5898 = vtanh.f32 %v2178_v0  ;;  %v2188_v42 = vadd.f32 %v2167_v13, %v2144_v34  ;;  %v6548_v59 = vpop.permute.xlu0 %2208  ;;  %v5542_v0 = vld [vmem:[%s7368_s7 + $0x600] ss:$24 sps:$4 sm:$0xff]   ;;  %v5568_v34 = vld [vmem:[%s7368_s7 + $0x6c4] ss:$24 sps:$4 sm:$0xff]  }
 0x1e1   : > { %4062 = vmatpush1.bf16.msra.mxu1 %v5528_v15  ;;  %v2180_v15 = vadd.f32 %v2159_v2, %v2136_v5  ;;  %5900 = vtanh.f32 %v2184_v4  ;;  %vm2211_vm3 = vcmp.eq.s32.totalorder %v6548_v59, 1 }
 0x1e2   : > { %4105 = vmatpush1.bf16.msra.mxu0 %v5529_v16  ;;  %4063 = vmatprep.subr.bf16.mxu1 %v5530_v17  ;;  %v2103_v16 = vrot.slane %v2078_v12, %v6533_v3  ;;  %v2138_v17 = vld [vmem:[#allocation3 + $0x20] sm:$0xff]  ;;  %5902 = vtanh.f32 %v2112_v6  ;;  %v2171_v12 = vrot.slane %v6511_v29, %v6533_v3 }
 0x1e3   : > { %4106 = vmatprep.subr.bf16.mxu0 %v5532_v18  ;;  %v6539_v18 = vpop.eup %5880  ;;  %5904 = vtanh.f32 %v2118_v10 }
 0x1e4   : > { %5906 = vtanh.f32 %v2180_v15  ;;  %v2183_v44 = vadd.f32 %v2171_v12, %v2139_v36  ;;  %v5566_v36 = vld [vmem:[%s7368_s7 + $0x6c0] ss:$24 sps:$4 sm:$0xff]  }
 0x1e5   : > { %4064 = vmatpush1.bf16.msra.mxu1 %v5534_v19  ;;  %v2186_v19 = vadd.f32 %v2159_v2, %v2142_v7  ;;  %v5545_v7 = vld [vmem:[%s7368_s7 + $0x8] ss:$24 sps:$4 sm:$0xff]  }
 0x1e6   : > { %4107 = vmatpush1.bf16.msra.mxu0 %v5535_v20  ;;  %4065 = vmatprep.subr.bf16.mxu1 %v5536_v9  ;;  %v2071_v20 = vld [vmem:[#allocation2 + $0x28] sm:$0xff]  ;;  %v5883_v9 = vpop.eup %5882 }
 0x1e7   : > { %4108 = vmatprep.subr.bf16.mxu0 %v5538_v21  ;;  %v2077_v21 = vld [vmem:[#allocation2 + $0x58] sm:$0xff]  ;;  %v2115_v27 = vadd.f32 %v2103_v16, %v2071_v20  ;;  %5908 = vtanh.f32 %v2186_v19  ;;  %v2213_v60 = vsel %vm2210_vm2, %v5879_v14, %v5883_v9  ;;  %v5548_v20 = vld [vmem:[%s7368_s7 + $0x630] ss:$24 sps:$4 sm:$0xff]  }
 0x1e8   : > { %v2121_v33 = vadd.f32 %v2103_v16, %v2077_v21  ;;  %v5550_v16 = vld [vmem:[%s7368_s7 + $0x634] ss:$24 sps:$4 sm:$0xff]   ;;  %v5551_v9 = vld [vmem:[%s7368_s7 + $0x38] ss:$24 sps:$4 sm:$0xff]  }
 0x1e9   : > { %4066 = vmatpush1.bf16.msra.mxu1 %v5540_v22  ;;  %v2114_v22 = vadd.f32 %v2099_v8, %v2070_v11  ;;  %v5553_v21 = vld [vmem:[%s7368_s7 + $0x3c] ss:$24 sps:$4 sm:$0xff]  }
 0x1ea   : > { %4109 = vmatpush1.bf16.msra.mxu0 %v5541_v23  ;;  %4164 = vmatprep.subr.bf16.mxu1 %v5547_v25  ;;  %v5885_v23 = vpop.eup %5884  ;;  %v2182_v25 = vadd.f32 %v2167_v13, %v2138_v17 }
 0x1eb   : > { %4121 = vmatprep.subr.bf16.mxu0 %v5544_v24  ;;  %v2145_v24 = vld [vmem:[#allocation3 + $0x58] sm:$0xff]  ;;  %v5887_v26 = vpop.eup %5886  ;;  %5910 = vtanh.f32 %v2114_v22  ;;  %v2219_v5 = vsel %vm2211_vm3, %v6539_v18, %v5885_v23 }
 0x1ec   : > { %v5889_v32 = vpop.eup %5888  ;;  %v2189_v37 = vadd.f32 %v2171_v12, %v2145_v24  ;;  %5912 = vtanh.f32 %v2182_v25  ;;  %v6574_v11 = vpack.c.bf16 %v2219_v5, %v2213_v60  ;;  %v5556_v24 = vld [vmem:[%s7368_s7 + $0x664] ss:$24 sps:$4 sm:$0xff]   ;;  %v5562_v12 = vld [vmem:[%s7368_s7 + $0x694] ss:$24 sps:$4 sm:$0xff]   ;;  %v5599_v60 = vld [vmem:[%s7368_s7 + $0x1b8] ss:$24 sps:$4 sm:$0xff]  }
 0x1ed   : > { %v5891_v35 = vpop.eup %5890  ;;  %5914 = vtanh.f32 %v2115_v27  ;;  %v5559_v25 = vld [vmem:[%s7368_s7 + $0x6c] ss:$24 sps:$4 sm:$0xff]   ;;  %v5557_v27 = vld [vmem:[%s7368_s7 + $0x68] ss:$24 sps:$4 sm:$0xff]  }
 0x1ee   : > { %v5893_v38 = vpop.eup %5892  ;;  %5916 = vtanh.f32 %v2121_v33  ;;  %v2215_v63 = vsel %vm2210_vm2, %v5887_v26, %v5891_v35  ;;  %4067 = vmatprep.mubr.bf16.mxu1 %v6574_v11  ;;  %v5554_v26 = vld [vmem:[%s7368_s7 + $0x660] ss:$24 sps:$4 sm:$0xff]   ;;  %v5571_v35 = vld [vmem:[%s7368_s7 + $0xcc] ss:$24 sps:$4 sm:$0xff]   ;;  %v5608_v5 = vld [vmem:[%s7368_s7 + $0x810] ss:$24 sps:$4 sm:$0xff]  }
 0x1ef   : > { %v5895_v41 = vpop.eup %5894  ;;  %5918 = vtanh.f32 %v2189_v37  ;;  %v2221_v6 = vsel %vm2211_vm3, %v5889_v32, %v5893_v38  ;;  %v5560_v32 = vld [vmem:[%s7368_s7 + $0x690] ss:$24 sps:$4 sm:$0xff]   ;;  %v5574_v38 = vld [vmem:[%s7368_s7 + $0x6f4] ss:$24 sps:$4 sm:$0xff]  }
 0x1f0   : > { %v5897_v43 = vpop.eup %5896  ;;  %5920 = vtanh.f32 %v2120_v40  ;;  %v6576_v13 = vpack.c.bf16 %v2221_v6, %v2215_v63  ;;  %v5563_v33 = vld [vmem:[%s7368_s7 + $0x98] ss:$24 sps:$4 sm:$0xff]   ;;  %v5569_v37 = vld [vmem:[%s7368_s7 + $0xc8] ss:$24 sps:$4 sm:$0xff]   ;;  %v5577_v40 = vld [vmem:[%s7368_s7 + $0xfc] ss:$24 sps:$4 sm:$0xff]  }
 0x1f1   : > { %v5899_v45 = vpop.eup %5898  ;;  %5922 = vtanh.f32 %v2188_v42  ;;  %v5575_v42 = vld [vmem:[%s7368_s7 + $0xf8] ss:$24 sps:$4 sm:$0xff]   ;;  %v5607_v63 = vld [vmem:[%s7368_s7 + $0x1ec] ss:$24 sps:$4 sm:$0xff]  }
 0x1f2   : > { %v5901_v29 = vpop.eup %5900  ;;  %5924 = vtanh.f32 %v2183_v44  ;;  %v2212_v1 = vsel %vm2210_vm2, %v5895_v41, %v5899_v45  ;;  %4110 = vmatprep.mubr.bf16.mxu0 %v6576_v13  ;;  %v5572_v41 = vld [vmem:[%s7368_s7 + $0x6f0] ss:$24 sps:$4 sm:$0xff]   ;;  %v5583_v44 = vld [vmem:[%s7368_s7 + $0x12c] ss:$24 sps:$4 sm:$0xff]   ;;  %v5578_v45 = vld [vmem:[%s7368_s7 + $0x720] ss:$24 sps:$4 sm:$0xff]  }
 0x1f3   : > { %v5903_v46 = vpop.eup %5902  ;;  %v2218_v8 = vsel %vm2211_vm3, %v5897_v43, %v5901_v29  ;;  %v5580_v43 = vld [vmem:[%s7368_s7 + $0x724] ss:$24 sps:$4 sm:$0xff]   ;;  %v5581_v29 = vld [vmem:[%s7368_s7 + $0x128] ss:$24 sps:$4 sm:$0xff]   ;;  %v5611_v6 = vld [vmem:[%s7368_s7 + $0x218] ss:$24 sps:$4 sm:$0xff]  }
 0x1f4   : > { %v5905_v47 = vpop.eup %5904  ;;  %v6578_v14 = vpack.c.bf16 %v2218_v8, %v2212_v1  ;;  %v5605_v1 = vld [vmem:[%s7368_s7 + $0x1e8] ss:$24 sps:$4 sm:$0xff]   ;;  %v5619_v8 = vld [vmem:[%s7368_s7 + $0x24c] ss:$24 sps:$4 sm:$0xff]  }
 0x1f5   : > { %v5907_v48 = vpop.eup %5906 }
 0x1f6   : > { %v5909_v49 = vpop.eup %5908  ;;  %v2214_v2 = vsel %vm2210_vm2, %v5903_v46, %v5907_v48  ;;  %4068 = vmatmul.mubr.bf16.vlgmr.msra.gmra.mrb[0].mxu1 %v6578_v14  ;;  %v5586_v46 = vld [vmem:[%s7368_s7 + $0x754] ss:$24 sps:$4 sm:$0xff]   ;;  %v5584_v48 = vld [vmem:[%s7368_s7 + $0x750] ss:$24 sps:$4 sm:$0xff]  }
 0x1f7   : > { %v5911_v51 = vpop.eup %5910  ;;  %v2220_v10 = vsel %vm2211_vm3, %v5905_v47, %v5909_v49  ;;  %4165 = vmatpush1.bf16.msra.mxu1 %v5545_v7  ;;  %4196 = vmatprep.mubr.bf16.mxu1 %v6574_v11  ;;  %v5589_v47 = vld [vmem:[%s7368_s7 + $0x15c] ss:$24 sps:$4 sm:$0xff]   ;;  %v5587_v49 = vld [vmem:[%s7368_s7 + $0x158] ss:$24 sps:$4 sm:$0xff]  }
 0x1f8   : > { %v5913_v52 = vpop.eup %5912  ;;  %v6580_v15 = vpack.c.bf16 %v2220_v10, %v2214_v2  ;;  %4166 = vmatprep.subr.bf16.mxu1 %v5553_v21  ;;  %v5610_v2 = vld [vmem:[%s7368_s7 + $0x814] ss:$24 sps:$4 sm:$0xff]   ;;  %v5616_v7 = vld [vmem:[%s7368_s7 + $0x844] ss:$24 sps:$4 sm:$0xff]   ;;  %v5614_v10 = vld [vmem:[%s7368_s7 + $0x840] ss:$24 sps:$4 sm:$0xff]  }
 0x1f9   : > { %v5915_v54 = vpop.eup %5914  ;;  %v2216_v57 = vsel %vm2210_vm2, %v5911_v51, %v5913_v52  ;;  %v5592_v51 = vld [vmem:[%s7368_s7 + $0x784] ss:$24 sps:$4 sm:$0xff]  }
 0x1fa   : > { %v5917_v55 = vpop.eup %5916  ;;  %4111 = vmatmul.mubr.bf16.vlgmr.msra.gmra.mrb[0].mxu0 %v6580_v15  ;;  %v5595_v52 = vld [vmem:[%s7368_s7 + $0x18c] ss:$24 sps:$4 sm:$0xff]  }
 0x1fb   : > { %v5919_v56 = vpop.eup %5918  ;;  %4122 = vmatpush1.bf16.msra.mxu0 %v5542_v0  ;;  %4167 = vmatpush1.bf16.msra.mxu1 %v5551_v9  ;;  %v5602_v0 = vld [vmem:[%s7368_s7 + $0x7e0] ss:$24 sps:$4 sm:$0xff]   ;;  %v5628_v9 = vld [vmem:[%s7368_s7 + $0x8a4] ss:$24 sps:$4 sm:$0xff]  }
 0x1fc   : > { %v5921_v58 = vpop.eup %5920  ;;  %v2223_v17 = vsel %vm2211_vm3, %v5917_v55, %v5919_v56  ;;  %4123 = vmatprep.subr.bf16.mxu0 %v5550_v16  ;;  %4168 = vmatprep.subr.bf16.mxu1 %v5559_v25  ;;  %v5593_v55 = vld [vmem:[%s7368_s7 + $0x188] ss:$24 sps:$4 sm:$0xff]   ;;  %v5598_v56 = vld [vmem:[%s7368_s7 + $0x7b4] ss:$24 sps:$4 sm:$0xff]  }
 0x1fd   : > { %v5923_v62 = vpop.eup %5922  ;;  %v5617_v16 = vld [vmem:[%s7368_s7 + $0x248] ss:$24 sps:$4 sm:$0xff]   ;;  %v5631_v21 = vld [vmem:[%s7368_s7 + $0x2ac] ss:$24 sps:$4 sm:$0xff]  }
 0x1fe   : > { %v5925_v4 = vpop.eup %5924  ;;  %v2222_v18 = vsel %vm2211_vm3, %v5921_v58, %v5923_v62  ;;  %v5596_v58 = vld [vmem:[%s7368_s7 + $0x7b0] ss:$24 sps:$4 sm:$0xff]   ;;  %v5604_v62 = vld [vmem:[%s7368_s7 + $0x7e4] ss:$24 sps:$4 sm:$0xff]  }
 0x1ff   : > { %v2217_v19 = vsel %vm2210_vm2, %v5915_v54, %v5925_v4  ;;  %v6602_v22 = vpack.c.bf16 %v2222_v18, %v2216_v57  ;;  %4124 = vmatpush1.bf16.msra.mxu0 %v5548_v20  ;;  %4169 = vmatpush1.bf16.msra.mxu1 %v5557_v27  ;;  %v5590_v54 = vld [vmem:[%s7368_s7 + $0x780] ss:$24 sps:$4 sm:$0xff]   ;;  %v5601_v57 = vld [vmem:[%s7368_s7 + $0x1bc] ss:$24 sps:$4 sm:$0xff]  }
 0x200   : > { %v6606_v23 = vpack.c.bf16 %v2223_v17, %v2217_v19  ;;  %4125 = vmatprep.subr.bf16.mxu0 %v5556_v24  ;;  %4170 = vmatprep.subr.bf16.mxu1 %v5565_v30  ;;  %v5613_v4 = vld [vmem:[%s7368_s7 + $0x21c] ss:$24 sps:$4 sm:$0xff]   ;;  %v5620_v19 = vld [vmem:[%s7368_s7 + $0x870] ss:$24 sps:$4 sm:$0xff]   ;;  %v5626_v24 = vld [vmem:[%s7368_s7 + $0x8a0] ss:$24 sps:$4 sm:$0xff]  }
 0x201   : > { %v5622_v17 = vld [vmem:[%s7368_s7 + $0x874] ss:$24 sps:$4 sm:$0xff]   ;;  %v5623_v20 = vld [vmem:[%s7368_s7 + $0x278] ss:$24 sps:$4 sm:$0xff]   ;;  %v5629_v25 = vld [vmem:[%s7368_s7 + $0x2a8] ss:$24 sps:$4 sm:$0xff]  }
 0x202   : > { %4153 = vmatprep.mubr.bf16.mxu0 %v6606_v23  ;;  %v5625_v18 = vld [vmem:[%s7368_s7 + $0x27c] ss:$24 sps:$4 sm:$0xff]   ;;  %v5635_v30 = vld [vmem:[%s7368_s7 + $0x2d8] ss:$24 sps:$4 sm:$0xff]  }
 0x203   : > { %4126 = vmatpush1.bf16.msra.mxu0 %v5554_v26  ;;  %4171 = vmatpush1.bf16.msra.mxu1 %v5563_v33  ;;  %v5634_v26 = vld [vmem:[%s7368_s7 + $0x8d4] ss:$24 sps:$4 sm:$0xff]  }
 0x204   : > { %4127 = vmatprep.subr.bf16.mxu0 %v5562_v12  ;;  %4172 = vmatprep.subr.bf16.mxu1 %v5571_v35  ;;  %v5637_v27 = vld [vmem:[%s7368_s7 + $0x2dc] ss:$24 sps:$4 sm:$0xff]   ;;  %v5632_v12 = vld [vmem:[%s7368_s7 + $0x8d0] ss:$24 sps:$4 sm:$0xff]  }
 0x205   : > { %v5643_v33 = vld [vmem:[%s7368_s7 + $0x14] ss:$24 sps:$4 sm:$0xff]   ;;  %v5641_v35 = vld [vmem:[%s7368_s7 + $0x10] ss:$24 sps:$4 sm:$0xff]  }
 0x207   : > { %4128 = vmatpush1.bf16.msra.mxu0 %v5560_v32  ;;  %4173 = vmatpush1.bf16.msra.mxu1 %v5569_v37  ;;  %v5640_v32 = vld [vmem:[%s7368_s7 + $0x30c] ss:$24 sps:$4 sm:$0xff]  }
 0x208   : > { %4129 = vmatprep.subr.bf16.mxu0 %v5568_v34  ;;  %4174 = vmatprep.subr.bf16.mxu1 %v5577_v40  ;;  %v5638_v34 = vld [vmem:[%s7368_s7 + $0x308] ss:$24 sps:$4 sm:$0xff]   ;;  %v5649_v37 = vld [vmem:[%s7368_s7 + $0x44] ss:$24 sps:$4 sm:$0xff]  }
 0x209   : > { %v5647_v40 = vld [vmem:[%s7368_s7 + $0x40] ss:$24 sps:$4 sm:$0xff]  }
 0x20b   : > { %4130 = vmatpush1.bf16.msra.mxu0 %v5566_v36  ;;  %4175 = vmatpush1.bf16.msra.mxu1 %v5575_v42  ;;  %v5646_v36 = vld [vmem:[%s7368_s7 + $0x33c] ss:$24 sps:$4 sm:$0xff]  }
 0x20c   : > { %4131 = vmatprep.subr.bf16.mxu0 %v5574_v38  ;;  %4176 = vmatprep.subr.bf16.mxu1 %v5583_v44  ;;  %v5644_v38 = vld [vmem:[%s7368_s7 + $0x338] ss:$24 sps:$4 sm:$0xff]   ;;  %v5655_v42 = vld [vmem:[%s7368_s7 + $0x74] ss:$24 sps:$4 sm:$0xff]  }
 0x20d   : > { %v5658_v44 = vld [vmem:[%s7368_s7 + $0x39c] ss:$24 sps:$4 sm:$0xff]  }
 0x20f   : > { %4132 = vmatpush1.bf16.msra.mxu0 %v5572_v41  ;;  %4177 = vmatpush1.bf16.msra.mxu1 %v5581_v29  ;;  %v5652_v41 = vld [vmem:[%s7368_s7 + $0x36c] ss:$24 sps:$4 sm:$0xff]   ;;  %v5656_v29 = vld [vmem:[%s7368_s7 + $0x398] ss:$24 sps:$4 sm:$0xff]  }
 0x210   : > { %4133 = vmatprep.subr.bf16.mxu0 %v5580_v43  ;;  %4178 = vmatprep.subr.bf16.mxu1 %v5589_v47  ;;  %v5650_v43 = vld [vmem:[%s7368_s7 + $0x368] ss:$24 sps:$4 sm:$0xff]   ;;  %v5664_v47 = vld [vmem:[%s7368_s7 + $0x3cc] ss:$24 sps:$4 sm:$0xff]  }
 0x213   : > { %4134 = vmatpush1.bf16.msra.mxu0 %v5578_v45  ;;  %4179 = vmatpush1.bf16.msra.mxu1 %v5587_v49  ;;  %v5661_v45 = vld [vmem:[%s7368_s7 + $0xa4] ss:$24 sps:$4 sm:$0xff]   ;;  %v5662_v49 = vld [vmem:[%s7368_s7 + $0x3c8] ss:$24 sps:$4 sm:$0xff]  }
 0x214   : > { %4135 = vmatprep.subr.bf16.mxu0 %v5586_v46  ;;  %4180 = vmatprep.subr.bf16.mxu1 %v5595_v52  ;;  %v5659_v46 = vld [vmem:[%s7368_s7 + $0xa0] ss:$24 sps:$4 sm:$0xff]   ;;  %v5670_v52 = vld [vmem:[%s7368_s7 + $0x3fc] ss:$24 sps:$4 sm:$0xff]  }
 0x217   : > { %4136 = vmatpush1.bf16.msra.mxu0 %v5584_v48  ;;  %4181 = vmatpush1.bf16.msra.mxu1 %v5593_v55  ;;  %v5667_v48 = vld [vmem:[%s7368_s7 + $0xd4] ss:$24 sps:$4 sm:$0xff]   ;;  %v5668_v55 = vld [vmem:[%s7368_s7 + $0x3f8] ss:$24 sps:$4 sm:$0xff]  }
 0x218   : > { %4137 = vmatprep.subr.bf16.mxu0 %v5592_v51  ;;  %4182 = vmatprep.subr.bf16.mxu1 %v5601_v57  ;;  %v5665_v51 = vld [vmem:[%s7368_s7 + $0xd0] ss:$24 sps:$4 sm:$0xff]   ;;  %v5676_v57 = vld [vmem:[%s7368_s7 + $0x42c] ss:$24 sps:$4 sm:$0xff]  }
 0x21b   : > { %4138 = vmatpush1.bf16.msra.mxu0 %v5590_v54  ;;  %4183 = vmatpush1.bf16.msra.mxu1 %v5599_v60  ;;  %v5673_v54 = vld [vmem:[%s7368_s7 + $0x104] ss:$24 sps:$4 sm:$0xff]   ;;  %v5674_v60 = vld [vmem:[%s7368_s7 + $0x428] ss:$24 sps:$4 sm:$0xff]  }
 0x21c   : > { %4139 = vmatprep.subr.bf16.mxu0 %v5598_v56  ;;  %4184 = vmatprep.subr.bf16.mxu1 %v5607_v63  ;;  %v5671_v56 = vld [vmem:[%s7368_s7 + $0x100] ss:$24 sps:$4 sm:$0xff]   ;;  %v5682_v63 = vld [vmem:[%s7368_s7 + $0x45c] ss:$24 sps:$4 sm:$0xff]  }
 0x21f   : > { %4140 = vmatpush1.bf16.msra.mxu0 %v5596_v58  ;;  %4185 = vmatpush1.bf16.msra.mxu1 %v5605_v1  ;;  %v5679_v58 = vld [vmem:[%s7368_s7 + $0x134] ss:$24 sps:$4 sm:$0xff]   ;;  %v5680_v1 = vld [vmem:[%s7368_s7 + $0x458] ss:$24 sps:$4 sm:$0xff]  }
 0x220   : > { %4141 = vmatprep.subr.bf16.mxu0 %v5604_v62  ;;  %4186 = vmatprep.subr.bf16.mxu1 %v5613_v4  ;;  %v5677_v62 = vld [vmem:[%s7368_s7 + $0x130] ss:$24 sps:$4 sm:$0xff]   ;;  %v5688_v4 = vld [vmem:[%s7368_s7 + $0x48c] ss:$24 sps:$4 sm:$0xff]  }
 0x223   : > { %4142 = vmatpush1.bf16.msra.mxu0 %v5602_v0  ;;  %4187 = vmatpush1.bf16.msra.mxu1 %v5611_v6  ;;  %v5685_v0 = vld [vmem:[%s7368_s7 + $0x164] ss:$24 sps:$4 sm:$0xff]   ;;  %v5686_v6 = vld [vmem:[%s7368_s7 + $0x488] ss:$24 sps:$4 sm:$0xff]  }
 0x224   : > { %4143 = vmatprep.subr.bf16.mxu0 %v5610_v2  ;;  %4188 = vmatprep.subr.bf16.mxu1 %v5619_v8  ;;  %v5683_v2 = vld [vmem:[%s7368_s7 + $0x160] ss:$24 sps:$4 sm:$0xff]   ;;  %v5694_v8 = vld [vmem:[%s7368_s7 + $0x4bc] ss:$24 sps:$4 sm:$0xff]  }
 0x227   : > { %4144 = vmatpush1.bf16.msra.mxu0 %v5608_v5  ;;  %4189 = vmatpush1.bf16.msra.mxu1 %v5617_v16  ;;  %v5691_v5 = vld [vmem:[%s7368_s7 + $0x194] ss:$24 sps:$4 sm:$0xff]   ;;  %v5692_v16 = vld [vmem:[%s7368_s7 + $0x4b8] ss:$24 sps:$4 sm:$0xff]  }
 0x228   : > { %4145 = vmatprep.subr.bf16.mxu0 %v5616_v7  ;;  %4190 = vmatprep.subr.bf16.mxu1 %v5625_v18  ;;  %v5689_v7 = vld [vmem:[%s7368_s7 + $0x190] ss:$24 sps:$4 sm:$0xff]   ;;  %v5700_v18 = vld [vmem:[%s7368_s7 + $0x4ec] ss:$24 sps:$4 sm:$0xff]  }
 0x22b   : > { %4146 = vmatpush1.bf16.msra.mxu0 %v5614_v10  ;;  %4191 = vmatpush1.bf16.msra.mxu1 %v5623_v20  ;;  %v5697_v10 = vld [vmem:[%s7368_s7 + $0x1c4] ss:$24 sps:$4 sm:$0xff]   ;;  %v5698_v20 = vld [vmem:[%s7368_s7 + $0x4e8] ss:$24 sps:$4 sm:$0xff]  }
 0x22c   : > { %4147 = vmatprep.subr.bf16.mxu0 %v5622_v17  ;;  %4192 = vmatprep.subr.bf16.mxu1 %v5631_v21  ;;  %v5695_v17 = vld [vmem:[%s7368_s7 + $0x1c0] ss:$24 sps:$4 sm:$0xff]   ;;  %v5706_v21 = vld [vmem:[%s7368_s7 + $0x51c] ss:$24 sps:$4 sm:$0xff]  }
 0x22f   : > { %4148 = vmatpush1.bf16.msra.mxu0 %v5620_v19  ;;  %4193 = vmatpush1.bf16.msra.mxu1 %v5629_v25  ;;  %v5703_v19 = vld [vmem:[%s7368_s7 + $0x1f4] ss:$24 sps:$4 sm:$0xff]   ;;  %v5704_v25 = vld [vmem:[%s7368_s7 + $0x518] ss:$24 sps:$4 sm:$0xff]  }
 0x230   : > { %4149 = vmatprep.subr.bf16.mxu0 %v5628_v9  ;;  %4194 = vmatprep.subr.bf16.mxu1 %v5637_v27  ;;  %v5701_v9 = vld [vmem:[%s7368_s7 + $0x1f0] ss:$24 sps:$4 sm:$0xff]   ;;  %v5712_v27 = vld [vmem:[%s7368_s7 + $0x54c] ss:$24 sps:$4 sm:$0xff]  }
 0x233   : > { %4150 = vmatpush1.bf16.msra.mxu0 %v5626_v24  ;;  %4195 = vmatpush1.bf16.msra.mxu1 %v5635_v30  ;;  %v5709_v24 = vld [vmem:[%s7368_s7 + $0x224] ss:$24 sps:$4 sm:$0xff]   ;;  %v5710_v30 = vld [vmem:[%s7368_s7 + $0x548] ss:$24 sps:$4 sm:$0xff]  }
 0x234   : > { %4151 = vmatprep.subr.bf16.mxu0 %v5634_v26  ;;  %4207 = vmatprep.subr.bf16.mxu1 %v5640_v32  ;;  %v5707_v26 = vld [vmem:[%s7368_s7 + $0x220] ss:$24 sps:$4 sm:$0xff]   ;;  %v5713_v32 = vld [vmem:[%s7368_s7 + $0x250] ss:$24 sps:$4 sm:$0xff]  }
 0x236   : > { %4197 = vmatmul.mubr.bf16.vlgmr.msra.gmra.mrb[4].mxu1 %v6578_v14 }
 0x237   : > { %4152 = vmatpush1.bf16.msra.mxu0 %v5632_v12  ;;  %4208 = vmatpush1.bf16.msra.mxu1 %v5638_v34  ;;  %v5715_v12 = vld [vmem:[%s7368_s7 + $0x254] ss:$24 sps:$4 sm:$0xff]   ;;  %v5721_v34 = vld [vmem:[%s7368_s7 + $0x284] ss:$24 sps:$4 sm:$0xff]  }
 0x238   : > { %4293 = vmatprep.subr.bf16.mxu0 %v5643_v33  ;;  %4239 = vmatprep.mubr.bf16.mxu1 %v6576_v13  ;;  %v5718_v33 = vld [vmem:[%s7368_s7 + $0x57c] ss:$24 sps:$4 sm:$0xff]  }
 0x239   : > { %4209 = vmatprep.subr.bf16.mxu1 %v5646_v36  ;;  %v5719_v36 = vld [vmem:[%s7368_s7 + $0x280] ss:$24 sps:$4 sm:$0xff]  }
 0x23a   : > { %4154 = vmatmul.mubr.bf16.vlgmr.msra.gmra.mrb[0].mxu0 %v6602_v22 }
 0x23b   : > { %4294 = vmatpush1.bf16.msra.mxu0 %v5641_v35  ;;  %4325 = vmatprep.mubr.bf16.mxu0 %v6574_v11  ;;  %v5653_v11 = vld [vmem:[%s7368_s7 + $0x70] ss:$24 sps:$4 sm:$0xff]  }
 0x23c   : > { %4295 = vmatprep.subr.bf16.mxu0 %v5649_v37  ;;  %4210 = vmatpush1.bf16.msra.mxu1 %v5644_v38  ;;  %v5716_v35 = vld [vmem:[%s7368_s7 + $0x578] ss:$24 sps:$4 sm:$0xff]   ;;  %v5724_v37 = vld [vmem:[%s7368_s7 + $0x5ac] ss:$24 sps:$4 sm:$0xff]  }
 0x23d   : > { %4211 = vmatprep.subr.bf16.mxu1 %v5652_v41  ;;  %v5727_v38 = vld [vmem:[%s7368_s7 + $0x2b4] ss:$24 sps:$4 sm:$0xff]   ;;  %v5725_v41 = vld [vmem:[%s7368_s7 + $0x2b0] ss:$24 sps:$4 sm:$0xff]  }
 0x23f   : > { %4296 = vmatpush1.bf16.msra.mxu0 %v5647_v40  ;;  %v5722_v40 = vld [vmem:[%s7368_s7 + $0x5a8] ss:$24 sps:$4 sm:$0xff]  }
 0x240   : > { %4297 = vmatprep.subr.bf16.mxu0 %v5655_v42  ;;  %4212 = vmatpush1.bf16.msra.mxu1 %v5650_v43  ;;  %v5730_v42 = vld [vmem:[%s7368_s7 + $0x5dc] ss:$24 sps:$4 sm:$0xff]  }
 0x241   : > { %4213 = vmatprep.subr.bf16.mxu1 %v5658_v44  ;;  %v5733_v43 = vld [vmem:[%s7368_s7 + $0x2e4] ss:$24 sps:$4 sm:$0xff]   ;;  %v5731_v44 = vld [vmem:[%s7368_s7 + $0x2e0] ss:$24 sps:$4 sm:$0xff]  }
 0x243   : > { %4298 = vmatpush1.bf16.msra.mxu0 %v5653_v11  ;;  %v5728_v11 = vld [vmem:[%s7368_s7 + $0x5d8] ss:$24 sps:$4 sm:$0xff]  }
 0x244   : > { %4299 = vmatprep.subr.bf16.mxu0 %v5661_v45  ;;  %4214 = vmatpush1.bf16.msra.mxu1 %v5656_v29  ;;  %v5736_v45 = vld [vmem:[%s7368_s7 + $0x60c] ss:$24 sps:$4 sm:$0xff]  }
 0x245   : > { %4215 = vmatprep.subr.bf16.mxu1 %v5664_v47  ;;  %v5739_v29 = vld [vmem:[%s7368_s7 + $0x314] ss:$24 sps:$4 sm:$0xff]   ;;  %v5737_v47 = vld [vmem:[%s7368_s7 + $0x310] ss:$24 sps:$4 sm:$0xff]  }
 0x247   : > { %4300 = vmatpush1.bf16.msra.mxu0 %v5659_v46  ;;  %v5734_v46 = vld [vmem:[%s7368_s7 + $0x608] ss:$24 sps:$4 sm:$0xff]  }
 0x248   : > { %4301 = vmatprep.subr.bf16.mxu0 %v5667_v48  ;;  %4216 = vmatpush1.bf16.msra.mxu1 %v5662_v49  ;;  %v5742_v48 = vld [vmem:[%s7368_s7 + $0x63c] ss:$24 sps:$4 sm:$0xff]  }
 0x249   : > { %4217 = vmatprep.subr.bf16.mxu1 %v5670_v52  ;;  %v5745_v49 = vld [vmem:[%s7368_s7 + $0x344] ss:$24 sps:$4 sm:$0xff]   ;;  %v5743_v52 = vld [vmem:[%s7368_s7 + $0x340] ss:$24 sps:$4 sm:$0xff]  }
 0x24b   : > { %4302 = vmatpush1.bf16.msra.mxu0 %v5665_v51  ;;  %v5740_v51 = vld [vmem:[%s7368_s7 + $0x638] ss:$24 sps:$4 sm:$0xff]  }
 0x24c   : > { %4303 = vmatprep.subr.bf16.mxu0 %v5673_v54  ;;  %4218 = vmatpush1.bf16.msra.mxu1 %v5668_v55  ;;  %v5748_v54 = vld [vmem:[%s7368_s7 + $0x66c] ss:$24 sps:$4 sm:$0xff]   ;;  %v5746_v55 = vld [vmem:[%s7368_s7 + $0x668] ss:$24 sps:$4 sm:$0xff]  }
 0x24d   : > { %4219 = vmatprep.subr.bf16.mxu1 %v5676_v57  ;;  %v5757_v57 = vld [vmem:[%s7368_s7 + $0x3a4] ss:$24 sps:$4 sm:$0xff]  }
 0x24f   : > { %4304 = vmatpush1.bf16.msra.mxu0 %v5671_v56  ;;  %v5749_v56 = vld [vmem:[%s7368_s7 + $0x370] ss:$24 sps:$4 sm:$0xff]  }
 0x250   : > { %4305 = vmatprep.subr.bf16.mxu0 %v5679_v58  ;;  %4220 = vmatpush1.bf16.msra.mxu1 %v5674_v60  ;;  %v5752_v58 = vld [vmem:[%s7368_s7 + $0x698] ss:$24 sps:$4 sm:$0xff]  }
 0x251   : > { %4221 = vmatprep.subr.bf16.mxu1 %v5682_v63  ;;  %v5755_v60 = vld [vmem:[%s7368_s7 + $0x3a0] ss:$24 sps:$4 sm:$0xff]   ;;  %v5763_v63 = vld [vmem:[%s7368_s7 + $0x3d4] ss:$24 sps:$4 sm:$0xff]  }
 0x253   : > { %4306 = vmatpush1.bf16.msra.mxu0 %v5677_v62  ;;  %v5760_v62 = vld [vmem:[%s7368_s7 + $0x6cc] ss:$24 sps:$4 sm:$0xff]  }
 0x254   : > { %4307 = vmatprep.subr.bf16.mxu0 %v5685_v0  ;;  %4222 = vmatpush1.bf16.msra.mxu1 %v5680_v1  ;;  %v5758_v0 = vld [vmem:[%s7368_s7 + $0x6c8] ss:$24 sps:$4 sm:$0xff]  }
 0x255   : > { %4223 = vmatprep.subr.bf16.mxu1 %v5688_v4  ;;  %v5761_v1 = vld [vmem:[%s7368_s7 + $0x3d0] ss:$24 sps:$4 sm:$0xff]   ;;  %v5769_v4 = vld [vmem:[%s7368_s7 + $0x404] ss:$24 sps:$4 sm:$0xff]  }
 0x257   : > { %4308 = vmatpush1.bf16.msra.mxu0 %v5683_v2  ;;  %v5766_v2 = vld [vmem:[%s7368_s7 + $0x6fc] ss:$24 sps:$4 sm:$0xff]  }
 0x258   : > { %4309 = vmatprep.subr.bf16.mxu0 %v5691_v5  ;;  %4224 = vmatpush1.bf16.msra.mxu1 %v5686_v6  ;;  %v5764_v5 = vld [vmem:[%s7368_s7 + $0x6f8] ss:$24 sps:$4 sm:$0xff]  }
 0x259   : > { %4225 = vmatprep.subr.bf16.mxu1 %v5694_v8  ;;  %v5767_v6 = vld [vmem:[%s7368_s7 + $0x400] ss:$24 sps:$4 sm:$0xff]   ;;  %v5775_v8 = vld [vmem:[%s7368_s7 + $0x434] ss:$24 sps:$4 sm:$0xff]  }
 0x25b   : > { %4310 = vmatpush1.bf16.msra.mxu0 %v5689_v7  ;;  %v5772_v7 = vld [vmem:[%s7368_s7 + $0x72c] ss:$24 sps:$4 sm:$0xff]  }
 0x25c   : > { %4311 = vmatprep.subr.bf16.mxu0 %v5697_v10  ;;  %4226 = vmatpush1.bf16.msra.mxu1 %v5692_v16  ;;  %v5770_v10 = vld [vmem:[%s7368_s7 + $0x728] ss:$24 sps:$4 sm:$0xff]  }
 0x25d   : > { %4227 = vmatprep.subr.bf16.mxu1 %v5700_v18  ;;  %v5773_v16 = vld [vmem:[%s7368_s7 + $0x430] ss:$24 sps:$4 sm:$0xff]   ;;  %v5781_v18 = vld [vmem:[%s7368_s7 + $0x464] ss:$24 sps:$4 sm:$0xff]  }
 0x25f   : > { %4312 = vmatpush1.bf16.msra.mxu0 %v5695_v17  ;;  %v5778_v17 = vld [vmem:[%s7368_s7 + $0x75c] ss:$24 sps:$4 sm:$0xff]  }
 0x260   : > { %4313 = vmatprep.subr.bf16.mxu0 %v5703_v19  ;;  %4228 = vmatpush1.bf16.msra.mxu1 %v5698_v20  ;;  %v5776_v19 = vld [vmem:[%s7368_s7 + $0x758] ss:$24 sps:$4 sm:$0xff]  }
 0x261   : > { %4229 = vmatprep.subr.bf16.mxu1 %v5706_v21  ;;  %v5779_v20 = vld [vmem:[%s7368_s7 + $0x460] ss:$24 sps:$4 sm:$0xff]   ;;  %v5787_v21 = vld [vmem:[%s7368_s7 + $0x494] ss:$24 sps:$4 sm:$0xff]  }
 0x263   : > { %4314 = vmatpush1.bf16.msra.mxu0 %v5701_v9  ;;  %v5784_v9 = vld [vmem:[%s7368_s7 + $0x78c] ss:$24 sps:$4 sm:$0xff]  }
 0x264   : > { %4315 = vmatprep.subr.bf16.mxu0 %v5709_v24  ;;  %4230 = vmatpush1.bf16.msra.mxu1 %v5704_v25  ;;  %v5782_v24 = vld [vmem:[%s7368_s7 + $0x788] ss:$24 sps:$4 sm:$0xff]  }
 0x265   : > { %4231 = vmatprep.subr.bf16.mxu1 %v5712_v27  ;;  %v5785_v25 = vld [vmem:[%s7368_s7 + $0x490] ss:$24 sps:$4 sm:$0xff]   ;;  %v5793_v27 = vld [vmem:[%s7368_s7 + $0x4c4] ss:$24 sps:$4 sm:$0xff]  }
 0x267   : > { %4316 = vmatpush1.bf16.msra.mxu0 %v5707_v26  ;;  %v5790_v26 = vld [vmem:[%s7368_s7 + $0x7bc] ss:$24 sps:$4 sm:$0xff]  }
 0x268   : > { %4317 = vmatprep.subr.bf16.mxu0 %v5715_v12  ;;  %4232 = vmatpush1.bf16.msra.mxu1 %v5710_v30  ;;  %v5788_v12 = vld [vmem:[%s7368_s7 + $0x7b8] ss:$24 sps:$4 sm:$0xff]  }
 0x269   : > { %4233 = vmatprep.subr.bf16.mxu1 %v5718_v33  ;;  %v5791_v30 = vld [vmem:[%s7368_s7 + $0x4c0] ss:$24 sps:$4 sm:$0xff]   ;;  %v5799_v33 = vld [vmem:[%s7368_s7 + $0x4f4] ss:$24 sps:$4 sm:$0xff]  }
 0x26b   : > { %4318 = vmatpush1.bf16.msra.mxu0 %v5713_v32  ;;  %v5796_v32 = vld [vmem:[%s7368_s7 + $0x7ec] ss:$24 sps:$4 sm:$0xff]  }
 0x26c   : > { %4319 = vmatprep.subr.bf16.mxu0 %v5721_v34  ;;  %4234 = vmatpush1.bf16.msra.mxu1 %v5716_v35  ;;  %v5794_v34 = vld [vmem:[%s7368_s7 + $0x7e8] ss:$24 sps:$4 sm:$0xff]  }
 0x26d   : > { %4235 = vmatprep.subr.bf16.mxu1 %v5724_v37  ;;  %v5797_v35 = vld [vmem:[%s7368_s7 + $0x4f0] ss:$24 sps:$4 sm:$0xff]   ;;  %v5805_v37 = vld [vmem:[%s7368_s7 + $0x524] ss:$24 sps:$4 sm:$0xff]  }
 0x26f   : > { %4320 = vmatpush1.bf16.msra.mxu0 %v5719_v36  ;;  %v5802_v36 = vld [vmem:[%s7368_s7 + $0x81c] ss:$24 sps:$4 sm:$0xff]  }
 0x270   : > { %4321 = vmatprep.subr.bf16.mxu0 %v5727_v38  ;;  %4236 = vmatpush1.bf16.msra.mxu1 %v5722_v40  ;;  %v5800_v38 = vld [vmem:[%s7368_s7 + $0x818] ss:$24 sps:$4 sm:$0xff]  }
 0x271   : > { %4237 = vmatprep.subr.bf16.mxu1 %v5730_v42  ;;  %v5803_v40 = vld [vmem:[%s7368_s7 + $0x520] ss:$24 sps:$4 sm:$0xff]   ;;  %v5811_v42 = vld [vmem:[%s7368_s7 + $0x554] ss:$24 sps:$4 sm:$0xff]  }
 0x273   : > { %4322 = vmatpush1.bf16.msra.mxu0 %v5725_v41  ;;  %v5808_v41 = vld [vmem:[%s7368_s7 + $0x84c] ss:$24 sps:$4 sm:$0xff]  }
 0x274   : > { %4323 = vmatprep.subr.bf16.mxu0 %v5733_v43  ;;  %4238 = vmatpush1.bf16.msra.mxu1 %v5728_v11  ;;  %v5806_v43 = vld [vmem:[%s7368_s7 + $0x848] ss:$24 sps:$4 sm:$0xff]  }
 0x275   : > { %4250 = vmatprep.subr.bf16.mxu1 %v5736_v45  ;;  %v5809_v11 = vld [vmem:[%s7368_s7 + $0x550] ss:$24 sps:$4 sm:$0xff]   ;;  %v5817_v45 = vld [vmem:[%s7368_s7 + $0x584] ss:$24 sps:$4 sm:$0xff]  }
 0x277   : > { %4324 = vmatpush1.bf16.msra.mxu0 %v5731_v44  ;;  %4240 = vmatmul.mubr.bf16.vlgmr.msra.gmra.mrb[4].mxu1 %v6580_v15  ;;  %v5814_v44 = vld [vmem:[%s7368_s7 + $0x87c] ss:$24 sps:$4 sm:$0xff]  }
 0x278   : > { %4336 = vmatprep.subr.bf16.mxu0 %v5739_v29  ;;  %4251 = vmatpush1.bf16.msra.mxu1 %v5734_v46  ;;  %v5812_v29 = vld [vmem:[%s7368_s7 + $0x878] ss:$24 sps:$4 sm:$0xff]  }
 0x279   : > { %4282 = vmatprep.mubr.bf16.mxu1 %v6606_v23  ;;  %4252 = vmatprep.subr.bf16.mxu1 %v5742_v48  ;;  %v5815_v46 = vld [vmem:[%s7368_s7 + $0x580] ss:$24 sps:$4 sm:$0xff]   ;;  %v5823_v48 = vld [vmem:[%s7368_s7 + $0x5b4] ss:$24 sps:$4 sm:$0xff]  }
 0x27a   : > { %4326 = vmatmul.mubr.bf16.vlgmr.msra.gmra.mrb[4].mxu0 %v6578_v14  ;;  %v5751_v14 = vld [vmem:[%s7368_s7 + $0x374] ss:$24 sps:$4 sm:$0xff]  }
 0x27b   : > { %4337 = vmatpush1.bf16.msra.mxu0 %v5737_v47  ;;  %4368 = vmatprep.mubr.bf16.mxu0 %v6576_v13  ;;  %v5754_v13 = vld [vmem:[%s7368_s7 + $0x69c] ss:$24 sps:$4 sm:$0xff]   ;;  %v5820_v47 = vld [vmem:[%s7368_s7 + $0x8ac] ss:$24 sps:$4 sm:$0xff]  }
 0x27c   : > { %4338 = vmatprep.subr.bf16.mxu0 %v5745_v49  ;;  %4253 = vmatpush1.bf16.msra.mxu1 %v5740_v51  ;;  %v5818_v49 = vld [vmem:[%s7368_s7 + $0x8a8] ss:$24 sps:$4 sm:$0xff]  }
 0x27d   : > { %4254 = vmatprep.subr.bf16.mxu1 %v5748_v54  ;;  %v5821_v51 = vld [vmem:[%s7368_s7 + $0x5b0] ss:$24 sps:$4 sm:$0xff]   ;;  %v5829_v54 = vld [vmem:[%s7368_s7 + $0x5e4] ss:$24 sps:$4 sm:$0xff]  }
 0x27f   : > { %4339 = vmatpush1.bf16.msra.mxu0 %v5743_v52  ;;  %v5826_v52 = vld [vmem:[%s7368_s7 + $0x8dc] ss:$24 sps:$4 sm:$0xff]  }
 0x280   : > { %4340 = vmatprep.subr.bf16.mxu0 %v5751_v14  ;;  %4255 = vmatpush1.bf16.msra.mxu1 %v5746_v55  ;;  %v5824_v14 = vld [vmem:[%s7368_s7 + $0x8d8] ss:$24 sps:$4 sm:$0xff]  }
 0x281   : > { %4256 = vmatprep.subr.bf16.mxu1 %v5754_v13  ;;  %v5827_v55 = vld [vmem:[%s7368_s7 + $0x5e0] ss:$24 sps:$4 sm:$0xff]   ;;  %v5830_v13 = vld [vmem:[%s7368_s7 + $0x610] ss:$24 sps:$4 sm:$0xff]  }
 0x283   : > { %4341 = vmatpush1.bf16.msra.mxu0 %v5749_v56  ;;  %v5832_v56 = vld [vmem:[%s7368_s7 + $0x614] ss:$24 sps:$4 sm:$0xff]  }
 0x284   : > { %4342 = vmatprep.subr.bf16.mxu0 %v5757_v57  ;;  %4257 = vmatpush1.bf16.msra.mxu1 %v5752_v58  ;;  %v5835_v57 = vld [vmem:[%s7368_s7 + $0x644] ss:$24 sps:$4 sm:$0xff]   ;;  %v5833_v58 = vld [vmem:[%s7368_s7 + $0x640] ss:$24 sps:$4 sm:$0xff]  }
 0x285   : > { %4258 = vmatprep.subr.bf16.mxu1 %v5760_v62  ;;  %v5836_v62 = vld [vmem:[%s7368_s7 + $0x670] ss:$24 sps:$4 sm:$0xff]  }
 0x287   : > { %4343 = vmatpush1.bf16.msra.mxu0 %v5755_v60  ;;  %v5838_v60 = vld [vmem:[%s7368_s7 + $0x674] ss:$24 sps:$4 sm:$0xff]  }
 0x288   : > { %4344 = vmatprep.subr.bf16.mxu0 %v5763_v63  ;;  %4259 = vmatpush1.bf16.msra.mxu1 %v5758_v0  ;;  %v5844_v63 = vld [vmem:[%s7368_s7 + $0x6d4] ss:$24 sps:$4 sm:$0xff]   ;;  %v7203_v0 = vld [vmem:[%s7369_s8 + $0x1] ss:$2 sm:$0x3f] }
 0x289   : > { %4260 = vmatprep.subr.bf16.mxu1 %v5766_v2  ;;  %v5842_v2 = vld [vmem:[%s7368_s7 + $0x6d0] ss:$24 sps:$4 sm:$0xff]  }
 0x28b   : > { %4345 = vmatpush1.bf16.msra.mxu0 %v5761_v1  ;;  %v7208_v1 = vld [vmem:[%s7369_s8] ss:$2 sm:$0x3f] }
 0x28c   : > { %4346 = vmatprep.subr.bf16.mxu0 %v5769_v4  ;;  %4261 = vmatpush1.bf16.msra.mxu1 %v5764_v5  ;;  %v2525_v4 = vrot.slane %v7203_v0, %v6519_v39  ;;  %v2556_v5 = vrot.slane %v7208_v1, %v6519_v39 }
 0x28d   : > { %4262 = vmatprep.subr.bf16.mxu1 %v5772_v7  ;;  %v2529_v7 = vrot.slane %v7203_v0, %v6503_v28 }
 0x28f   : > { %4347 = vmatpush1.bf16.msra.mxu0 %v5767_v6  ;;  %v5847_v6 = vld [vmem:[%s7368_s7 + $0x704] ss:$24 sps:$4 sm:$0xff]  }
 0x290   : > { %4348 = vmatprep.subr.bf16.mxu0 %v5775_v8  ;;  %4263 = vmatpush1.bf16.msra.mxu1 %v5770_v10  ;;  %v2560_v8 = vrot.slane %v7208_v1, %v6503_v28  ;;  %v5845_v10 = vld [vmem:[%s7368_s7 + $0x700] ss:$24 sps:$4 sm:$0xff]  }
 0x291   : > { %4264 = vmatprep.subr.bf16.mxu1 %v5778_v17 }
 0x293   : > { %4349 = vmatpush1.bf16.msra.mxu0 %v5773_v16  ;;  %v2583_v16 = vsel %vm2210_vm2, %v2525_v4, %v2556_v5 }
 0x294   : > { %4350 = vmatprep.subr.bf16.mxu0 %v5781_v18  ;;  %4265 = vmatpush1.bf16.msra.mxu1 %v5776_v19  ;;  %v5850_v18 = vld [vmem:[%s7368_s7 + $0x734] ss:$24 sps:$4 sm:$0xff]  }
 0x295   : > { %4266 = vmatprep.subr.bf16.mxu1 %v5784_v9 }
 0x297   : > { %4351 = vmatpush1.bf16.msra.mxu0 %v5779_v20  ;;  %v2584_v20 = vsel %vm2210_vm2, %v2529_v7, %v2560_v8 }
 0x298   : > { %4352 = vmatprep.subr.bf16.mxu0 %v5787_v21  ;;  %4267 = vmatpush1.bf16.msra.mxu1 %v5782_v24  ;;  %v2589_v24 = vsel %vm2211_vm3, %v2525_v4, %v2556_v5 }
 0x299   : > { %4268 = vmatprep.subr.bf16.mxu1 %v5790_v26 }
 0x29b   : > { %4353 = vmatpush1.bf16.msra.mxu0 %v5785_v25 }
 0x29c   : > { %4354 = vmatprep.subr.bf16.mxu0 %v5793_v27  ;;  %4269 = vmatpush1.bf16.msra.mxu1 %v5788_v12  ;;  %v2590_v27 = vsel %vm2211_vm3, %v2529_v7, %v2560_v8 }
 0x29d   : > { %4270 = vmatprep.subr.bf16.mxu1 %v5796_v32 }
 0x29f   : > { %4355 = vmatpush1.bf16.msra.mxu0 %v5791_v30  ;;  %v5848_v30 = vld [vmem:[%s7368_s7 + $0x730] ss:$24 sps:$4 sm:$0xff]  }
 0x2a0   : > { %4356 = vmatprep.subr.bf16.mxu0 %v5799_v33  ;;  %4271 = vmatpush1.bf16.msra.mxu1 %v5794_v34  ;;  %v5853_v33 = vld [vmem:[%s7368_s7 + $0x764] ss:$24 sps:$4 sm:$0xff]   ;;  %v5851_v34 = vld [vmem:[%s7368_s7 + $0x760] ss:$24 sps:$4 sm:$0xff]  }
 0x2a1   : > { %4272 = vmatprep.subr.bf16.mxu1 %v5802_v36  ;;  %v5854_v36 = vld [vmem:[%s7368_s7 + $0x790] ss:$24 sps:$4 sm:$0xff]  }
 0x2a3   : > { %4357 = vmatpush1.bf16.msra.mxu0 %v5797_v35  ;;  %v5856_v35 = vld [vmem:[%s7368_s7 + $0x794] ss:$24 sps:$4 sm:$0xff]  }
 0x2a4   : > { %4358 = vmatprep.subr.bf16.mxu0 %v5805_v37  ;;  %4273 = vmatpush1.bf16.msra.mxu1 %v5800_v38  ;;  %v5859_v37 = vld [vmem:[%s7368_s7 + $0x7c4] ss:$24 sps:$4 sm:$0xff]   ;;  %v5857_v38 = vld [vmem:[%s7368_s7 + $0x7c0] ss:$24 sps:$4 sm:$0xff]  }
 0x2a5   : > { %4274 = vmatprep.subr.bf16.mxu1 %v5808_v41  ;;  %v5860_v41 = vld [vmem:[%s7368_s7 + $0x7f0] ss:$24 sps:$4 sm:$0xff]  }
 0x2a7   : > { %4359 = vmatpush1.bf16.msra.mxu0 %v5803_v40  ;;  %v5862_v40 = vld [vmem:[%s7368_s7 + $0x7f4] ss:$24 sps:$4 sm:$0xff]  }
 0x2a8   : > { %4360 = vmatprep.subr.bf16.mxu0 %v5811_v42  ;;  %4275 = vmatpush1.bf16.msra.mxu1 %v5806_v43  ;;  %v5865_v42 = vld [vmem:[%s7368_s7 + $0x824] ss:$24 sps:$4 sm:$0xff]   ;;  %v5863_v43 = vld [vmem:[%s7368_s7 + $0x820] ss:$24 sps:$4 sm:$0xff]  }
 0x2a9   : > { %4276 = vmatprep.subr.bf16.mxu1 %v5814_v44  ;;  %v5866_v44 = vld [vmem:[%s7368_s7 + $0x850] ss:$24 sps:$4 sm:$0xff]  }
 0x2ab   : > { %4361 = vmatpush1.bf16.msra.mxu0 %v5809_v11  ;;  %v5868_v11 = vld [vmem:[%s7368_s7 + $0x854] ss:$24 sps:$4 sm:$0xff]  }
 0x2ac   : > { %4362 = vmatprep.subr.bf16.mxu0 %v5817_v45  ;;  %4277 = vmatpush1.bf16.msra.mxu1 %v5812_v29  ;;  %v5871_v45 = vld [vmem:[%s7368_s7 + $0x884] ss:$24 sps:$4 sm:$0xff]   ;;  %v5869_v29 = vld [vmem:[%s7368_s7 + $0x880] ss:$24 sps:$4 sm:$0xff]  }
 0x2ad   : > { %4278 = vmatprep.subr.bf16.mxu1 %v5820_v47  ;;  %v5872_v47 = vld [vmem:[%s7368_s7 + $0x8b0] ss:$24 sps:$4 sm:$0xff]  }
 0x2af   : > { %4363 = vmatpush1.bf16.msra.mxu0 %v5815_v46  ;;  %v5874_v46 = vld [vmem:[%s7368_s7 + $0x8b4] ss:$24 sps:$4 sm:$0xff]  }
 0x2b0   : > { %4364 = vmatprep.subr.bf16.mxu0 %v5823_v48  ;;  %4279 = vmatpush1.bf16.msra.mxu1 %v5818_v49  ;;  %v5877_v48 = vld [vmem:[%s7368_s7 + $0x8e4] ss:$24 sps:$4 sm:$0xff]   ;;  %v5875_v49 = vld [vmem:[%s7368_s7 + $0x8e0] ss:$24 sps:$4 sm:$0xff]  }
 0x2b1   : > { %4280 = vmatprep.subr.bf16.mxu1 %v5826_v52 }
 0x2b3   : > { %4365 = vmatpush1.bf16.msra.mxu0 %v5821_v51  ;;  %v7299_v51 = vld [vmem:[%s7370_s9] sm:$0x3f] }
 0x2b4   : > { %4366 = vmatprep.subr.bf16.mxu0 %v5829_v54  ;;  %4281 = vmatpush1.bf16.msra.mxu1 %v5824_v14  ;;  %v4439_v14 = vrot.slane %v7299_v51, %v6519_v39  ;;  %v2533_v39 = vrot.slane %v7203_v0, %v6524_v50 }
 0x2b7   : > { %4367 = vmatpush1.bf16.msra.mxu0 %v5827_v55  ;;  %4283 = vmatmul.mubr.bf16.vlgmr.msra.gmra.mrb[4].mxu1 %v6602_v22 }
 0x2b8   : > { %4379 = vmatprep.subr.bf16.mxu0 %v5832_v56 }
 0x2ba   : > { %4369 = vmatmul.mubr.bf16.vlgmr.msra.gmra.mrb[4].mxu0 %v6580_v15  ;;  %v5841_v15 = vld [vmem:[%s7368_s7 + $0x6a4] ss:$24 sps:$4 sm:$0xff]  }
 0x2bb   : > { %4380 = vmatpush1.bf16.msra.mxu0 %v5830_v13  ;;  %4411 = vmatprep.mubr.bf16.mxu0 %v6606_v23  ;;  %v5839_v23 = vld [vmem:[%s7368_s7 + $0x6a0] ss:$24 sps:$4 sm:$0xff]   ;;  %v4443_v13 = vrot.slane %v7299_v51, %v6503_v28  ;;  %v2564_v28 = vrot.slane %v7208_v1, %v6524_v50 }
 0x2bc   : > { %4381 = vmatprep.subr.bf16.mxu0 %v5835_v57 }
 0x2bf   : > { %4382 = vmatpush1.bf16.msra.mxu0 %v5833_v58 }
 0x2c0   : > { %4383 = vmatprep.subr.bf16.mxu0 %v5838_v60 }
 0x2c3   : > { %4384 = vmatpush1.bf16.msra.mxu0 %v5836_v62 }
 0x2c4   : > { %4385 = vmatprep.subr.bf16.mxu0 %v5841_v15 }
 0x2c7   : > { %4386 = vmatpush1.bf16.msra.mxu0 %v5839_v23 }
 0x2c8   : > { %4387 = vmatprep.subr.bf16.mxu0 %v5844_v63 }
 0x2c9   : > { %v4069_v17 = vpop.f32.mrb[0].mxu1 }
 0x2ca   : > { %v4070_v19 = vadd.f32 %v4069_v17, %v2583_v16  ;;  %v4071_v9 = vpop.f32.mrb[1].mxu1  ;;  %v2568_v16 = vrot.slane %v7208_v1, %v6514_v31  ;;  %v2585_v17 = vsel %vm2210_vm2, %v2533_v39, %v2564_v28 }
 0x2cb   : > { %4388 = vmatpush1.bf16.msra.mxu0 %v5842_v2  ;;  %v4072_v21 = vadd.f32 %v4071_v9, %v2584_v20  ;;  %v4073_v25 = vpop.f32.mrb[2].mxu1  ;;  %v4447_v20 = vrot.slane %v7299_v51, %v6524_v50 }
 0x2cc   : > { %4389 = vmatprep.subr.bf16.mxu0 %v5847_v6  ;;  %v4074_v26 = vadd.f32 %v4073_v25, %v2589_v24  ;;  %v4075_v12 = vpop.f32.mrb[3].mxu1  ;;  %v4451_v25 = vrot.slane %v7299_v51, %v6514_v31 }
 0x2cd   : > { %v4076_v32 = vadd.f32 %v4075_v12, %v2590_v27 }
 0x2cf   : > { %4390 = vmatpush1.bf16.msra.mxu0 %v5845_v10  ;;  %v2537_v10 = vrot.slane %v7203_v0, %v6514_v31 }
 0x2d0   : > { %4391 = vmatprep.subr.bf16.mxu0 %v5850_v18 }
 0x2d1   : > { %v2586_v9 = vsel %vm2210_vm2, %v2537_v10, %v2568_v16 }
 0x2d3   : > { %4392 = vmatpush1.bf16.msra.mxu0 %v5848_v30 }
 0x2d4   : > { %4393 = vmatprep.subr.bf16.mxu0 %v5853_v33 }
 0x2d7   : > { %4394 = vmatpush1.bf16.msra.mxu0 %v5851_v34 }
 0x2d8   : > { %4395 = vmatprep.subr.bf16.mxu0 %v5856_v35 }
 0x2db   : > { %4396 = vmatpush1.bf16.msra.mxu0 %v5854_v36 }
 0x2dc   : > { %4397 = vmatprep.subr.bf16.mxu0 %v5859_v37 }
 0x2df   : > { %4398 = vmatpush1.bf16.msra.mxu0 %v5857_v38 }
 0x2e0   : > { %4399 = vmatprep.subr.bf16.mxu0 %v5862_v40 }
 0x2e3   : > { %4400 = vmatpush1.bf16.msra.mxu0 %v5860_v41 }
 0x2e4   : > { %4401 = vmatprep.subr.bf16.mxu0 %v5865_v42 }
 0x2e7   : > { %4402 = vmatpush1.bf16.msra.mxu0 %v5863_v43 }
 0x2e8   : > { %4403 = vmatprep.subr.bf16.mxu0 %v5868_v11 }
 0x2eb   : > { %4404 = vmatpush1.bf16.msra.mxu0 %v5866_v44  ;;  %v2541_v44 = vrot.slane %v7203_v0, %v6529_v61 }
 0x2ec   : > { %4405 = vmatprep.subr.bf16.mxu0 %v5871_v45  ;;  %v2572_v45 = vrot.slane %v7208_v1, %v6529_v61 }
 0x2ef   : > { %4406 = vmatpush1.bf16.msra.mxu0 %v5869_v29  ;;  %v2545_v29 = vrot.slane %v7203_v0, %v6533_v3 }
 0x2f0   : > { %4407 = vmatprep.subr.bf16.mxu0 %v5874_v46  ;;  %v2576_v46 = vrot.slane %v7208_v1, %v6533_v3  ;;  %v4459_v1 = vrot.slane %v7299_v51, %v6533_v3  ;;  %v5083_v3 = vld [vmem:[#allocation4] ss:$0 sm:$0xff] }
 0x2f3   : > { %4408 = vmatpush1.bf16.msra.mxu0 %v5872_v47  ;;  %v2587_v47 = vsel %vm2210_vm2, %v2541_v44, %v2572_v45 }
 0x2f4   : > { %4409 = vmatprep.subr.bf16.mxu0 %v5877_v48 }
 0x2f7   : > { %4410 = vmatpush1.bf16.msra.mxu0 %v5875_v49 }
 0x2fa   : > { %4412 = vmatmul.mubr.bf16.vlgmr.msra.gmra.mrb[4].mxu0 %v6602_v22 }
 0x30d   : > { %v4155_v52 = vpop.f32.mrb[0].mxu0 }
 0x30e   : > { %v5089_v54 = vadd.f32 %v4155_v52, %v4070_v19  ;;  %v4157_v55 = vpop.f32.mrb[1].mxu0  ;;  %v4455_v52 = vrot.slane %v7299_v51, %v6529_v61 }
 0x30f   : > { %v5091_v56 = vadd.f32 %v4157_v55, %v4072_v21  ;;  %v4159_v57 = vpop.f32.mrb[2].mxu0 }
 0x310   : > { %v4422_v58 = vmax.f32 %v5089_v54, 0.0  ;;  %v5093_v60 = vadd.f32 %v4159_v57, %v4074_v26  ;;  %v4161_v62 = vpop.f32.mrb[3].mxu0  ;;  %v2591_v26 = vsel %vm2211_vm3, %v2533_v39, %v2564_v28  ;;  %v2588_v54 = vsel %vm2210_vm2, %v2545_v29, %v2576_v46 }
 0x311   : > { %v4423_v22 = vmax.f32 %v5091_v56, 0.0  ;;  %v5095_v15 = vadd.f32 %v4161_v62, %v4076_v32  ;;  %v2592_v32 = vsel %vm2211_vm3, %v2537_v10, %v2568_v16  ;;  %v2593_v56 = vsel %vm2211_vm3, %v2541_v44, %v2572_v45 }
 0x312   : > { %v4466_v23 = vmul.f32 %v4439_v14, %v4422_v58  ;;  %v4428_v63 = vmax.f32 %v5093_v60, 0.0  ;;  %v2594_v58 = vsel %vm2211_vm3, %v2545_v29, %v2576_v46 }
 0x313   : > { %v4467_v2 = vmul.f32 %v4443_v13, %v4423_v22  ;;  %v4429_v4 = vmax.f32 %v5095_v15, 0.0 }
 0x314   : > { %v4472_v5 = vmul.f32 %v4439_v14, %v4428_v63 }
 0x315   : > { %v4478_v6 = vadd.f32 %v4467_v2, %v4466_v23  ;;  %v4473_v7 = vmul.f32 %v4443_v13, %v4429_v4 }
 0x317   : > { %v4485_v8 = vadd.f32 %v4473_v7, %v4472_v5 }
 0x38a   : > { %v4284_v18 = vpop.f32.mrb[4].mxu1 }
 0x38b   : > { %v5096_v19 = vadd.f32 %v4284_v18, %v2585_v17  ;;  %v4286_v21 = vpop.f32.mrb[5].mxu1 }
 0x38c   : > { %v5097_v24 = vadd.f32 %v4286_v21, %v2586_v9  ;;  %v4288_v27 = vpop.f32.mrb[6].mxu1 }
 0x38d   : > { %v4424_v12 = vmax.f32 %v5096_v19, 0.0  ;;  %v5098_v30 = vadd.f32 %v4288_v27, %v2591_v26  ;;  %v4290_v33 = vpop.f32.mrb[7].mxu1 }
 0x38e   : > { %v4425_v34 = vmax.f32 %v5097_v24, 0.0  ;;  %v5099_v50 = vadd.f32 %v4290_v33, %v2592_v32 }
 0x38f   : > { %v4468_v35 = vmul.f32 %v4447_v20, %v4424_v12  ;;  %v4430_v36 = vmax.f32 %v5098_v30, 0.0 }
 0x390   : > { %v4469_v37 = vmul.f32 %v4451_v25, %v4425_v34  ;;  %v4431_v38 = vmax.f32 %v5099_v50, 0.0 }
 0x391   : > { %v4479_v40 = vadd.f32 %v4478_v6, %v4468_v35  ;;  %v4474_v41 = vmul.f32 %v4447_v20, %v4430_v36 }
 0x392   : > { %v4475_v42 = vmul.f32 %v4451_v25, %v4431_v38 }
 0x393   : > { %v4486_v31 = vadd.f32 %v4485_v8, %v4474_v41  ;;  %v4480_v43 = vadd.f32 %v4479_v40, %v4469_v37 }
 0x395   : > { %v4487_v11 = vadd.f32 %v4486_v31, %v4475_v42 }
 0x3cd   : > { %v4413_v48 = vpop.f32.mrb[4].mxu0 }
 0x3ce   : > { %v5100_v49 = vadd.f32 %v4413_v48, %v2587_v47  ;;  %v4415_v14 = vpop.f32.mrb[5].mxu0 }
 0x3cf   : > { %v5101_v55 = vadd.f32 %v4415_v14, %v2588_v54  ;;  %v4417_v0 = vpop.f32.mrb[6].mxu0 }
 0x3d0   : > { %v4426_v13 = vmax.f32 %v5100_v49, 0.0  ;;  %v5102_v57 = vadd.f32 %v4417_v0, %v2593_v56  ;;  %v4419_v60 = vpop.f32.mrb[7].mxu0 }
 0x3d1   : > { %v4427_v62 = vmax.f32 %v5101_v55, 0.0  ;;  %v5103_v61 = vadd.f32 %v4419_v60, %v2594_v58 }
 0x3d2   : > { %v4470_v22 = vmul.f32 %v4455_v52, %v4426_v13  ;;  %v4432_v53 = vmax.f32 %v5102_v57, 0.0 }
 0x3d3   : > { %v4433_v15 = vmax.f32 %v5103_v61, 0.0  ;;  %v4471_v23 = vmul.f32 %v4459_v1, %v4427_v62 }
 0x3d4   : > { %v4476_v63 = vmul.f32 %v4455_v52, %v4432_v53  ;;  %v4481_v2 = vadd.f32 %v4480_v43, %v4470_v22 }
 0x3d5   : > { %v4477_v4 = vmul.f32 %v4459_v1, %v4433_v15 }
 0x3d6   : > { %v4482_v5 = vadd.f32 %v4481_v2, %v4471_v23  ;;  %v4488_v6 = vadd.f32 %v4487_v11, %v4476_v63 }
 0x3d8   : > { %4483 = vadd.xlane.f32.xlu1 %v4482_v5  ;;  %v4489_v7 = vadd.f32 %v4488_v6, %v4477_v4 }
 0x3dc   : > { %4490 = vadd.xlane.f32.xlu1 %v4489_v7 }
 0x465   : > { %v4484_v51 = vpop.xlane.xlu1 %4483 }
 0x466   : > { %v4499_v59 = vadd.f32 %v5083_v3, %v4484_v51 }
 0x468   : > { %4502 = vst.msk [vmem:[%s7372_s11] sm:$0xff] %vm4501_vm4, %v4499_v59 }
 0x469   : > { %v4491_v8 = vpop.xlane.xlu1 %4490 }
 0x46a   : > { %v4500_v39 = vadd.f32 %v5083_v3, %v4491_v8 }
 0x46c   : > { %4503 = vst.msk [vmem:[%s7372_s11 + $0x8] sm:$0xff] %vm4501_vm4, %v4500_v39 }
 0x46d PF: > { %p20_p11 = scmp.ge.s32.totalorder %s6034_s22, 5   ;;  %s7374_s19 = smov %s5944_s20 }
 0x46e   : > { %s7375_s20 = smov %s6043_s25  ;;  %s7376_s21 = smov %s6034_s22 }
 0x46f   :  { %22 = sbr.rel (!%p20_p11) target bundleno = 5 (0x5), region = 194 }

</bundles_post_ra>
